<compile_context>
chip_gen: v7x
topology: tpu7x:2x2x1
jax: 0.10.0
libtpu: 0.0.40
codegen_flags: <defaults>
</compile_context>

<pallas_src>
import functools

import numpy as np
import jax
import jax.numpy as jnp
from jax.experimental import pallas as pl
from jax.experimental.pallas import tpu as pltpu


def _round_up(x, m):
    return (x + m - 1) // m * m


# ---------------------------------------------------------------------------
# Pallas kernel: lane-dense matmul (bias already folded into the operands)
#   out (O, M) = A (O, KP) @ B (KP, M)     [+ optional sigmoid epilogue]
# ---------------------------------------------------------------------------
def _matmul_kernel(a_ref, b_ref, o_ref, *, apply_sigmoid):
    acc = jnp.dot(a_ref[...], b_ref[...], preferred_element_type=jnp.float32)
    if apply_sigmoid:
        # 1 / (1 + exp(-x)): exp and approx reciprocal both land on the EUP slot.
        acc = pl.reciprocal(1.0 + jnp.exp(-acc), approx=True)
    o_ref[...] = acc.astype(o_ref.dtype)


def matmul_lane_dense(a, b, apply_sigmoid=False):
    """Single-block matmul (shapes fit VMEM): bf16 (O,KP) @ bf16 (KP,M) -> f32 (O,M)."""
    O, KP = a.shape
    KP2, M = b.shape
    assert KP == KP2
    kernel = functools.partial(_matmul_kernel, apply_sigmoid=apply_sigmoid)
    return pl.pallas_call(
        kernel,
        out_shape=jax.ShapeDtypeStruct((O, M), jnp.float32),
        in_specs=[
            pl.BlockSpec((O, KP), lambda: (0, 0)),
            pl.BlockSpec((KP, M), lambda: (0, 0)),
        ],
        out_specs=pl.BlockSpec((O, M), lambda: (0, 0)),
        # Explicit scoped-VMEM headroom (v5e default is only 16 MiB).
        compiler_params=pltpu.CompilerParams(vmem_limit_bytes=32 * 1024 * 1024),
    )(a, b)


# ---------------------------------------------------------------------------
# Operand packing: fold bias, pad K to a multiple of 128, cast to bf16
# ---------------------------------------------------------------------------
def _augment_weights(w_mat, bias):
    """(O, K) f32 weights + (O,) bias -> bf16 (O, KP) with bias as an extra column."""
    O, K = w_mat.shape
    KP = _round_up(K + 1, 128)
    w_aug = jnp.concatenate([w_mat, bias[:, None]], axis=1)
    w_aug = jnp.pad(w_aug, ((0, 0), (0, KP - K - 1)))
    return w_aug.astype(jnp.bfloat16)


def _augment_patches(pT):
    """(K, M) patches -> bf16 (KP, M) with a ones-row (bias) and zero K-padding."""
    K, M = pT.shape
    KP = _round_up(K + 1, 128)
    p = jnp.concatenate([pT, jnp.ones((1, M), pT.dtype)], axis=0)
    p = jnp.pad(p, ((0, KP - K - 1), (0, 0)))
    return p.astype(jnp.bfloat16)


# ---------------------------------------------------------------------------
# im2col in channel-major (C, N, H, W) layout -> transposed patch matrix (K, M)
#   rows   : (c, i, j)  -> matches PyTorch OIHW weight .reshape(O, C*k*k)
#   columns: (n, ho, wo)
# Only strided slices / stack / reshape: no transposes.
# ---------------------------------------------------------------------------
def _im2col_T(x_cnhw, k, stride, pad):
    C, N, H, W = x_cnhw.shape
    xp = jnp.pad(x_cnhw, ((0, 0), (0, 0), (pad, pad), (pad, pad)))
    Ho = (H + 2 * pad - k) // stride + 1
    Wo = (W + 2 * pad - k) // stride + 1
    taps = []
    for i in range(k):
        for j in range(k):
            taps.append(xp[:, :, i:i + stride * Ho:stride, j:j + stride * Wo:stride])
    pT = jnp.stack(taps, axis=1)                      # (C, k*k, N, Ho, Wo)
    return pT.reshape(C * k * k, N * Ho * Wo), Ho, Wo


def conv2d_lane_dense(x_cnhw, w_aug, *, k, stride, pad, out_ch):
    """Conv2d as a lane-dense Pallas matmul; in/out feature maps are (C, N, H, W)."""
    N = x_cnhw.shape[1]
    pT, Ho, Wo = _im2col_T(x_cnhw, k, stride, pad)
    yT = matmul_lane_dense(w_aug, _augment_patches(pT))   # (O, N*Ho*Wo) f32, lane-dense
    return yT.reshape(out_ch, N, Ho, Wo)                   # free reinterpretation


# ---------------------------------------------------------------------------
# Deterministic parameter init (PyTorch-style uniform(-1/sqrt(fan_in), ...))
# ---------------------------------------------------------------------------
def _init_conv(key, out_c, in_c, k):
    fan_in = in_c * k * k
    bound = 1.0 / np.sqrt(fan_in)
    kw, kb = jax.random.split(key)
    w = jax.random.uniform(kw, (out_c, in_c, k, k), jnp.float32, -bound, bound)
    b = jax.random.uniform(kb, (out_c,), jnp.float32, -bound, bound)
    return w, b


def _init_linear(key, out_f, in_f):
    bound = 1.0 / np.sqrt(in_f)
    kw, kb = jax.random.split(key)
    w = jax.random.uniform(kw, (out_f, in_f), jnp.float32, -bound, bound)
    b = jax.random.uniform(kb, (out_f,), jnp.float32, -bound, bound)
    return w, b


def init_dnn_params(key):
    k1, k2, k3, k4, k5 = jax.random.split(key, 5)
    return {
        "conv1": _init_conv(k1, 24, 46, 4),
        "conv2": _init_conv(k2, 12, 24, 4),
        "conv3": _init_conv(k3, 5, 12, 4),
        "conv4": _init_conv(k4, 4, 5, 4),
        "fc1":   _init_linear(k5, 2, 36),
    }


def prepare_kernel_params(params):
    """One-time packing of PyTorch-layout params into kernel-ready bf16 matrices."""
    kp = {}
    for name in ("conv1", "conv2", "conv3"):
        w, b = params[name]
        O, C, k, _ = w.shape
        kp[name] = _augment_weights(w.reshape(O, C * k * k), b)

    # --- algebraic fusion of conv4 + flatten + fc1 (both are linear maps) ----
    # flatten order per sample is (c4, h, w): fc index = c4*9 + s, s = h*3 + w.
    w4, b4 = params["conv4"]                      # (4, 5, 4, 4), (4,)
    wf, bf = params["fc1"]                        # (2, 36), (2,)
    O4, C4, k4, _ = w4.shape
    w4m = w4.reshape(O4, C4 * k4 * k4)            # (4, 80)
    wfr = wf.reshape(wf.shape[0], O4, 9)          # (2, 4, 9)
    A = jnp.einsum("zcs,ck->zsk", wfr, w4m)       # (2, 9, 80): combined weight
    A2 = A.reshape(wf.shape[0], 9 * w4m.shape[1])              # (2, 720), q = s*80 + kk
    const = bf + jnp.einsum("zcs,c->z", wfr, b4)               # combined bias (2,)
    kp["head"] = _augment_weights(A2, const)                   # bf16 (2, 768)
    return kp


# ---------------------------------------------------------------------------
# Forward pass (matches DNN.forward)
# ---------------------------------------------------------------------------
def dnn_forward(x, kparams):
    # DNN.forward does swapaxes(1,3): (N,H,W,46) -> (N,46,W,H); additionally go
    # channel-major (C,N,W,H) so no transposes are needed between conv layers.
    x = jnp.transpose(x, (3, 0, 2, 1))                                  # (46, N, 50, 50)
    x = conv2d_lane_dense(x, kparams["conv1"], k=4, stride=2, pad=0, out_ch=24)
    x = conv2d_lane_dense(x, kparams["conv2"], k=4, stride=2, pad=1, out_ch=12)
    x = conv2d_lane_dense(x, kparams["conv3"], k=4, stride=2, pad=1, out_ch=5)

    # Fused conv4 + flatten + fc1 + sigmoid: one tiny matmul kernel.
    pT4, Ho, Wo = _im2col_T(x, 4, 2, 1)                                 # (80, N*9)
    K4 = pT4.shape[0]
    N = x.shape[1]
    p4 = pT4.reshape(K4, N, Ho * Wo)                                    # (80, N, 9)
    p4 = jnp.transpose(p4, (2, 0, 1)).reshape(Ho * Wo * K4, N)          # (720, N), q = s*80+kk
    logitsT = matmul_lane_dense(kparams["head"], _augment_patches(p4),
                                apply_sigmoid=True)                     # (2, N)
    return logitsT.T                                                    # (N, 2)


# Pure-JAX f32 reference for the correctness check.
def dnn_reference(x, params):
    x = jnp.swapaxes(x, 1, 3)

    def conv(x, w, b, stride, pad):
        y = jax.lax.conv_general_dilated(
            x, w, (stride, stride), [(pad, pad), (pad, pad)],
            dimension_numbers=("NCHW", "OIHW", "NCHW"))
        return y + b[None, :, None, None]

    x = conv(x, *params["conv1"], 2, 0)
    x = conv(x, *params["conv2"], 2, 1)
    x = conv(x, *params["conv3"], 2, 1)
    x = conv(x, *params["conv4"], 2, 1)
    x = x.reshape(x.shape[0], -1)
    w, b = params["fc1"]
    return jax.nn.sigmoid(x @ w.T + b)


if __name__ == "__main__":
    key = jax.random.PRNGKey(0)
    kx, kp = jax.random.split(key)

    # Spatial size fixed by the architecture: fc1 expects 36 = 4*3*3 features,
    # which requires 50x50 spatial input; batch 2, channels=46.
    x = jax.random.normal(kx, (2, 50, 50, 46), jnp.float32)
    params = init_dnn_params(kp)
    kparams = prepare_kernel_params(params)        # bf16, bias-folded, K padded

    fwd = jax.jit(dnn_forward)
    out = jax.block_until_ready(fwd(x, kparams))
    ref = jax.block_until_ready(dnn_reference(x, params))

    assert out.shape == (2, 2), out.shape
    # bf16 MXU operands with f32 accumulation -> compare at bf16-level tolerance
    # against the f32 reference (sigmoid outputs in (0,1)).
    np.testing.assert_allclose(np.asarray(out), np.asarray(ref), rtol=2e-2, atol=2e-2)
    print("KERNEL_OK")
</pallas_src>

<mosaic_0001>
module attributes {stable_mosaic.version = 11 : i64} {
  func.func @_matmul_kernel(%arg0: memref<24x768xbf16, #tpu.memory_space<vmem>>, %arg1: memref<768x1152xbf16, #tpu.memory_space<vmem>>, %arg2: memref<24x1152xf32, #tpu.memory_space<vmem>>) attributes {dimension_semantics = [], scalar_prefetch = 0 : i64, scratch_operands = 0 : i64, tpu.core_type = #tpu.core_type<tc>} {
    %c0 = arith.constant 0 : index
    %c0_0 = arith.constant 0 : index
    %0 = vector.load %arg0[%c0, %c0_0] : memref<24x768xbf16, #tpu.memory_space<vmem>>, vector<24x768xbf16>
    %c0_1 = arith.constant 0 : index
    %c0_2 = arith.constant 0 : index
    %1 = vector.load %arg1[%c0_1, %c0_2] : memref<768x1152xbf16, #tpu.memory_space<vmem>>, vector<768x1152xbf16>
    %cst = arith.constant dense<0.000000e+00> : vector<24x1152xf32>
    %2 = tpu.matmul %0, %1, %cst {dimension_numbers = #tpu.dot_dimension_numbers<[1], [0], [0], [1], [0, 0, 1, 1], [], []>} : vector<24x768xbf16>, vector<768x1152xbf16>, vector<24x1152xf32> -> vector<24x1152xf32>
    %c0_3 = arith.constant 0 : index
    %c0_4 = arith.constant 0 : index
    %3 = vector.load %arg2[%c0_3, %c0_4] : memref<24x1152xf32, #tpu.memory_space<vmem>>, vector<24x1152xf32>
    tpu.vector_store %arg2[%c0_3, %c0_4], %2 {strides = array<i32>} : memref<24x1152xf32, #tpu.memory_space<vmem>>, vector<24x1152xf32>,
    return
  }
}

module attributes {stable_mosaic.version = 11 : i64} {
  func.func @_matmul_kernel(%arg0: memref<12x512xbf16, #tpu.memory_space<vmem>>, %arg1: memref<512x288xbf16, #tpu.memory_space<vmem>>, %arg2: memref<12x288xf32, #tpu.memory_space<vmem>>) attributes {dimension_semantics = [], scalar_prefetch = 0 : i64, scratch_operands = 0 : i64, tpu.core_type = #tpu.core_type<tc>} {
    %c0 = arith.constant 0 : index
    %c0_0 = arith.constant 0 : index
    %0 = vector.load %arg0[%c0, %c0_0] : memref<12x512xbf16, #tpu.memory_space<vmem>>, vector<12x512xbf16>
    %c0_1 = arith.constant 0 : index
    %c0_2 = arith.constant 0 : index
    %1 = vector.load %arg1[%c0_1, %c0_2] : memref<512x288xbf16, #tpu.memory_space<vmem>>, vector<512x288xbf16>
    %cst = arith.constant dense<0.000000e+00> : vector<12x288xf32>
    %2 = tpu.matmul %0, %1, %cst {dimension_numbers = #tpu.dot_dimension_numbers<[1], [0], [0], [1], [0, 0, 1, 1], [], []>} : vector<12x512xbf16>, vector<512x288xbf16>, vector<12x288xf32> -> vector<12x288xf32>
    %c0_3 = arith.constant 0 : index
    %c0_4 = arith.constant 0 : index
    %3 = vector.load %arg2[%c0_3, %c0_4] : memref<12x288xf32, #tpu.memory_space<vmem>>, vector<12x288xf32>
    tpu.vector_store %arg2[%c0_3, %c0_4], %2 {strides = array<i32>} : memref<12x288xf32, #tpu.memory_space<vmem>>, vector<12x288xf32>,
    return
  }
}

module attributes {stable_mosaic.version = 11 : i64} {
  func.func @_matmul_kernel(%arg0: memref<5x256xbf16, #tpu.memory_space<vmem>>, %arg1: memref<256x72xbf16, #tpu.memory_space<vmem>>, %arg2: memref<5x72xf32, #tpu.memory_space<vmem>>) attributes {dimension_semantics = [], scalar_prefetch = 0 : i64, scratch_operands = 0 : i64, tpu.core_type = #tpu.core_type<tc>} {
    %c0 = arith.constant 0 : index
    %c0_0 = arith.constant 0 : index
    %0 = vector.load %arg0[%c0, %c0_0] : memref<5x256xbf16, #tpu.memory_space<vmem>>, vector<5x256xbf16>
    %c0_1 = arith.constant 0 : index
    %c0_2 = arith.constant 0 : index
    %1 = vector.load %arg1[%c0_1, %c0_2] : memref<256x72xbf16, #tpu.memory_space<vmem>>, vector<256x72xbf16>
    %cst = arith.constant dense<0.000000e+00> : vector<5x72xf32>
    %2 = tpu.matmul %0, %1, %cst {dimension_numbers = #tpu.dot_dimension_numbers<[1], [0], [0], [1], [0, 0, 1, 1], [], []>} : vector<5x256xbf16>, vector<256x72xbf16>, vector<5x72xf32> -> vector<5x72xf32>
    %c0_3 = arith.constant 0 : index
    %c0_4 = arith.constant 0 : index
    %3 = vector.load %arg2[%c0_3, %c0_4] : memref<5x72xf32, #tpu.memory_space<vmem>>, vector<5x72xf32>
    tpu.vector_store %arg2[%c0_3, %c0_4], %2 {strides = array<i32>} : memref<5x72xf32, #tpu.memory_space<vmem>>, vector<5x72xf32>,
    return
  }
}

module attributes {stable_mosaic.version = 11 : i64} {
  func.func @_matmul_kernel(%arg0: memref<2x768xbf16, #tpu.memory_space<vmem>>, %arg1: memref<768x2xbf16, #tpu.memory_space<vmem>>, %arg2: memref<2x2xf32, #tpu.memory_space<vmem>>) attributes {dimension_semantics = [], scalar_prefetch = 0 : i64, scratch_operands = 0 : i64, tpu.core_type = #tpu.core_type<tc>} {
    %c0 = arith.constant 0 : index
    %c0_0 = arith.constant 0 : index
    %0 = vector.load %arg0[%c0, %c0_0] : memref<2x768xbf16, #tpu.memory_space<vmem>>, vector<2x768xbf16>
    %c0_1 = arith.constant 0 : index
    %c0_2 = arith.constant 0 : index
    %1 = vector.load %arg1[%c0_1, %c0_2] : memref<768x2xbf16, #tpu.memory_space<vmem>>, vector<768x2xbf16>
    %cst = arith.constant dense<0.000000e+00> : vector<2x2xf32>
    %2 = tpu.matmul %0, %1, %cst {dimension_numbers = #tpu.dot_dimension_numbers<[1], [0], [0], [1], [0, 0, 1, 1], [], []>} : vector<2x768xbf16>, vector<768x2xbf16>, vector<2x2xf32> -> vector<2x2xf32>
    %cst_3 = arith.constant 0.000000e+00 : f32
    %3 = vector.broadcast %cst_3 : f32 to vector<2x2xf32>
    %4 = arith.subf %3, %2 : vector<2x2xf32>
    %5 = math.exp %4 : vector<2x2xf32>
    %cst_4 = arith.constant 1.000000e+00 : f32
    %6 = vector.broadcast %cst_4 : f32 to vector<2x2xf32>
    %7 = arith.addf %6, %5 : vector<2x2xf32>
    %8 = tpu.reciprocal %7 {approx = true} : vector<2x2xf32> -> vector<2x2xf32>
    %c0_5 = arith.constant 0 : index
    %c0_6 = arith.constant 0 : index
    %9 = vector.load %arg2[%c0_5, %c0_6] : memref<2x2xf32, #tpu.memory_space<vmem>>, vector<2x2xf32>
    tpu.vector_store %arg2[%c0_5, %c0_6], %8 {strides = array<i32>} : memref<2x2xf32, #tpu.memory_space<vmem>>, vector<2x2xf32>,
    return
  }
}

</mosaic_0001>

<bundles_post_ra>
// kernel: dnn_forward.4
= control target key start
LH: loop header
LB: loop body
LE: loop exit
PB: predicated region body
PF: predicated region fallthrough
CT: control target
= control target key end

     0   :  { %s6308_s1 = inlined_call_operand.vmem [shape: bf16[768,1152], index: 1, kind: input, shape index: {}]   ;;  %s6309_s0 = inlined_call_operand.vmem [shape: bf16[24,768], index: 0, kind: input, shape index: {}]   ;;  %s6310_s2 = inlined_call_operand.vmem [shape: f32[24,1152], index: 2, kind: output, shape index: {}]  }
   0x1   :  { %v4155_v0 = vld [vmem:[%s6308_s1 + $0x4] ss:$36 sps:$4 sm:$0xff]   ;;  %v4157_v1 = vld [vmem:[%s6308_s1 + $0xc] ss:$36 sps:$4 sm:$0xff]   ;;  %v4163_v5 = vld [vmem:[%s6308_s1 + $0x54] ss:$36 sps:$4 sm:$0xff]  }
   0x2   :  { %2760 = vmatprep.subr.bf16.mxu0 %v4155_v0  ;;  %v4159_v2 = vld [vmem:[%s6308_s1] ss:$36 sps:$4 sm:$0xff]   ;;  %v4160_v3 = vld [vmem:[%s6308_s1 + $0x8] ss:$36 sps:$4 sm:$0xff]   ;;  %2913 = vmatprep.subr.bf16.mxu1 %v4157_v1  ;;  %v4166_v7 = vld [vmem:[%s6308_s1 + $0x50] ss:$36 sps:$4 sm:$0xff]  }
   0x3   :  { %v4161_v4 = vld [vmem:[%s6308_s1 + $0x4c] ss:$36 sps:$4 sm:$0xff]   ;;  %2761 = vmatpush1.bf16.msra.mxu0 %v4159_v2  ;;  %2914 = vmatpush1.bf16.msra.mxu1 %v4160_v3  ;;  %v4167_v8 = vld [vmem:[%s6308_s1 + $0x94] ss:$36 sps:$4 sm:$0xff]   ;;  %v4169_v9 = vld [vmem:[%s6308_s1 + $0x9c] ss:$36 sps:$4 sm:$0xff]  }
   0x4   :  { %v4165_v6 = vld [vmem:[%s6308_s1 + $0x48] ss:$36 sps:$4 sm:$0xff]   ;;  %2762 = vmatprep.subr.bf16.mxu0 %v4161_v4  ;;  %2915 = vmatprep.subr.bf16.mxu1 %v4163_v5  ;;  %v4171_v10 = vld [vmem:[%s6308_s1 + $0x90] ss:$36 sps:$4 sm:$0xff]   ;;  %v4172_v11 = vld [vmem:[%s6308_s1 + $0x98] ss:$36 sps:$4 sm:$0xff]  }
   0x5   :  { %v4173_v12 = vld [vmem:[%s6308_s1 + $0xdc] ss:$36 sps:$4 sm:$0xff]   ;;  %v4175_v13 = vld [vmem:[%s6308_s1 + $0xe4] ss:$36 sps:$4 sm:$0xff]   ;;  %v4181_v17 = vld [vmem:[%s6308_s1 + $0x12c] ss:$36 sps:$4 sm:$0xff]  }
   0x6   :  { %v4177_v14 = vld [vmem:[%s6308_s1 + $0xd8] ss:$36 sps:$4 sm:$0xff]   ;;  %v4178_v15 = vld [vmem:[%s6308_s1 + $0xe0] ss:$36 sps:$4 sm:$0xff]   ;;  %v4184_v19 = vld [vmem:[%s6308_s1 + $0x128] ss:$36 sps:$4 sm:$0xff]  }
   0x7   :  { %2763 = vmatpush1.bf16.msra.mxu0 %v4165_v6  ;;  %2916 = vmatpush1.bf16.msra.mxu1 %v4166_v7  ;;  %v4179_v16 = vld [vmem:[%s6308_s1 + $0x124] ss:$36 sps:$4 sm:$0xff]   ;;  %v4185_v20 = vld [vmem:[%s6308_s1 + $0x16c] ss:$36 sps:$4 sm:$0xff]   ;;  %v4187_v21 = vld [vmem:[%s6308_s1 + $0x174] ss:$36 sps:$4 sm:$0xff]  }
   0x8   :  { %2764 = vmatprep.subr.bf16.mxu0 %v4167_v8  ;;  %2917 = vmatprep.subr.bf16.mxu1 %v4169_v9  ;;  %v4183_v18 = vld [vmem:[%s6308_s1 + $0x120] ss:$36 sps:$4 sm:$0xff]   ;;  %v4189_v22 = vld [vmem:[%s6308_s1 + $0x168] ss:$36 sps:$4 sm:$0xff]   ;;  %v4190_v23 = vld [vmem:[%s6308_s1 + $0x170] ss:$36 sps:$4 sm:$0xff]  }
   0x9   :  { %v4191_v24 = vld [vmem:[%s6308_s1 + $0x1b4] ss:$36 sps:$4 sm:$0xff]   ;;  %v4193_v25 = vld [vmem:[%s6308_s1 + $0x1bc] ss:$36 sps:$4 sm:$0xff]   ;;  %v4199_v29 = vld [vmem:[%s6308_s1 + $0x204] ss:$36 sps:$4 sm:$0xff]  }
   0xa   :  { %v4195_v26 = vld [vmem:[%s6308_s1 + $0x1b0] ss:$36 sps:$4 sm:$0xff]   ;;  %v4196_v27 = vld [vmem:[%s6308_s1 + $0x1b8] ss:$36 sps:$4 sm:$0xff]   ;;  %v4202_v31 = vld [vmem:[%s6308_s1 + $0x200] ss:$36 sps:$4 sm:$0xff]  }
   0xb   :  { %2765 = vmatpush1.bf16.msra.mxu0 %v4171_v10  ;;  %2918 = vmatpush1.bf16.msra.mxu1 %v4172_v11  ;;  %v4197_v28 = vld [vmem:[%s6308_s1 + $0x1fc] ss:$36 sps:$4 sm:$0xff]   ;;  %v4203_v32 = vld [vmem:[%s6308_s1 + $0x244] ss:$36 sps:$4 sm:$0xff]   ;;  %v4205_v33 = vld [vmem:[%s6308_s1 + $0x24c] ss:$36 sps:$4 sm:$0xff]  }
   0xc   :  { %2766 = vmatprep.subr.bf16.mxu0 %v4173_v12  ;;  %2919 = vmatprep.subr.bf16.mxu1 %v4175_v13  ;;  %v4201_v30 = vld [vmem:[%s6308_s1 + $0x1f8] ss:$36 sps:$4 sm:$0xff]   ;;  %v4207_v34 = vld [vmem:[%s6308_s1 + $0x240] ss:$36 sps:$4 sm:$0xff]   ;;  %v4208_v35 = vld [vmem:[%s6308_s1 + $0x248] ss:$36 sps:$4 sm:$0xff]  }
   0xd   :  { %v4209_v36 = vld [vmem:[%s6308_s1 + $0x28c] ss:$36 sps:$4 sm:$0xff]   ;;  %v4211_v37 = vld [vmem:[%s6308_s1 + $0x294] ss:$36 sps:$4 sm:$0xff]   ;;  %v4217_v41 = vld [vmem:[%s6308_s1 + $0x2dc] ss:$36 sps:$4 sm:$0xff]  }
   0xe   :  { %v4213_v38 = vld [vmem:[%s6308_s1 + $0x288] ss:$36 sps:$4 sm:$0xff]   ;;  %v4214_v39 = vld [vmem:[%s6308_s1 + $0x290] ss:$36 sps:$4 sm:$0xff]   ;;  %v4220_v43 = vld [vmem:[%s6308_s1 + $0x2d8] ss:$36 sps:$4 sm:$0xff]  }
   0xf   :  { %2767 = vmatpush1.bf16.msra.mxu0 %v4177_v14  ;;  %2920 = vmatpush1.bf16.msra.mxu1 %v4178_v15  ;;  %v4215_v40 = vld [vmem:[%s6308_s1 + $0x2d4] ss:$36 sps:$4 sm:$0xff]   ;;  %v4221_v44 = vld [vmem:[%s6308_s1 + $0x31c] ss:$36 sps:$4 sm:$0xff]   ;;  %v4223_v45 = vld [vmem:[%s6308_s1 + $0x324] ss:$36 sps:$4 sm:$0xff]  }
  0x10   :  { %2768 = vmatprep.subr.bf16.mxu0 %v4179_v16  ;;  %2921 = vmatprep.subr.bf16.mxu1 %v4181_v17  ;;  %v4219_v42 = vld [vmem:[%s6308_s1 + $0x2d0] ss:$36 sps:$4 sm:$0xff]   ;;  %v4225_v46 = vld [vmem:[%s6308_s1 + $0x318] ss:$36 sps:$4 sm:$0xff]   ;;  %v4226_v48 = vld [vmem:[%s6308_s1 + $0x320] ss:$36 sps:$4 sm:$0xff]  }
  0x11   :  { %v4251_v47 = vld [vmem:[%s6309_s0 + $0x4] ss:$24 sps:$4 sm:$0xff]   ;;  %v4229_v50 = vld [vmem:[%s6308_s1 + $0x36c] ss:$36 sps:$4 sm:$0xff]   ;;  %v4235_v54 = vld [vmem:[%s6308_s1 + $0x3b4] ss:$36 sps:$4 sm:$0xff]  }
  0x12   :  { %v4227_v49 = vld [vmem:[%s6308_s1 + $0x364] ss:$36 sps:$4 sm:$0xff]   ;;  %2792 = vmatprep.mubr.bf16.mxu0 %v4251_v47  ;;  %2945 = vmatprep.mubr.bf16.mxu1 %v4251_v47  ;;  %v4233_v53 = vld [vmem:[%s6308_s1 + $0x3ac] ss:$36 sps:$4 sm:$0xff]   ;;  %v4239_v57 = vld [vmem:[%s6308_s1 + $0x3f4] ss:$36 sps:$4 sm:$0xff]  }
  0x13   :  { %2769 = vmatpush1.bf16.msra.mxu0 %v4183_v18  ;;  %2922 = vmatpush1.bf16.msra.mxu1 %v4184_v19  ;;  %v4231_v51 = vld [vmem:[%s6308_s1 + $0x360] ss:$36 sps:$4 sm:$0xff]   ;;  %v4232_v52 = vld [vmem:[%s6308_s1 + $0x368] ss:$36 sps:$4 sm:$0xff]   ;;  %v4238_v56 = vld [vmem:[%s6308_s1 + $0x3b0] ss:$36 sps:$4 sm:$0xff]  }
  0x14   :  { %2770 = vmatprep.subr.bf16.mxu0 %v4185_v20  ;;  %2923 = vmatprep.subr.bf16.mxu1 %v4187_v21  ;;  %v4237_v55 = vld [vmem:[%s6308_s1 + $0x3a8] ss:$36 sps:$4 sm:$0xff]   ;;  %v4241_v58 = vld [vmem:[%s6308_s1 + $0x3fc] ss:$36 sps:$4 sm:$0xff]   ;;  %v4243_v59 = vld [vmem:[%s6308_s1 + $0x3f0] ss:$36 sps:$4 sm:$0xff]  }
  0x15   :  { %v4244_v60 = vld [vmem:[%s6308_s1 + $0x3f8] ss:$36 sps:$4 sm:$0xff]   ;;  %v4247_v62 = vld [vmem:[%s6308_s1 + $0x444] ss:$36 sps:$4 sm:$0xff]   ;;  %v4258_v2 = vld [vmem:[%s6308_s1 + $0x48c] ss:$36 sps:$4 sm:$0xff]  }
  0x16   :  { %v4245_v61 = vld [vmem:[%s6308_s1 + $0x43c] ss:$36 sps:$4 sm:$0xff]   ;;  %v4255_v1 = vld [vmem:[%s6308_s1 + $0x484] ss:$36 sps:$4 sm:$0xff]   ;;  %v4262_v6 = vld [vmem:[%s6308_s1 + $0x4cc] ss:$36 sps:$4 sm:$0xff]  }
  0x17   :  { %2771 = vmatpush1.bf16.msra.mxu0 %v4189_v22  ;;  %2924 = vmatpush1.bf16.msra.mxu1 %v4190_v23  ;;  %v4249_v63 = vld [vmem:[%s6308_s1 + $0x438] ss:$36 sps:$4 sm:$0xff]   ;;  %v4250_v0 = vld [vmem:[%s6308_s1 + $0x440] ss:$36 sps:$4 sm:$0xff]   ;;  %v4256_v4 = vld [vmem:[%s6308_s1 + $0x488] ss:$36 sps:$4 sm:$0xff]  }
  0x18   :  { %2772 = vmatprep.subr.bf16.mxu0 %v4191_v24  ;;  %2925 = vmatprep.subr.bf16.mxu1 %v4193_v25  ;;  %v4253_v3 = vld [vmem:[%s6308_s1 + $0x480] ss:$36 sps:$4 sm:$0xff]   ;;  %v4265_v7 = vld [vmem:[%s6308_s1 + $0x4d4] ss:$36 sps:$4 sm:$0xff]   ;;  %v4260_v8 = vld [vmem:[%s6308_s1 + $0x4c8] ss:$36 sps:$4 sm:$0xff]  }
  0x19   :  { %v4259_v5 = vld [vmem:[%s6309_s0] ss:$24 sps:$4 sm:$0xff]   ;;  %v4263_v9 = vld [vmem:[%s6308_s1 + $0x4d0] ss:$36 sps:$4 sm:$0xff]   ;;  %v4277_v15 = vld [vmem:[%s6308_s1 + $0x564] ss:$36 sps:$4 sm:$0xff]  }
  0x1a   :  { %v4268_v10 = vld [vmem:[%s6308_s1 + $0x514] ss:$36 sps:$4 sm:$0xff]   ;;  %v4271_v11 = vld [vmem:[%s6308_s1 + $0x51c] ss:$36 sps:$4 sm:$0xff]   ;;  %v4280_v18 = vld [vmem:[%s6308_s1 + $0x5a4] ss:$36 sps:$4 sm:$0xff]  }
  0x1b   :  { %2773 = vmatpush1.bf16.msra.mxu0 %v4195_v26  ;;  %2926 = vmatpush1.bf16.msra.mxu1 %v4196_v27  ;;  %v4266_v12 = vld [vmem:[%s6308_s1 + $0x510] ss:$36 sps:$4 sm:$0xff]   ;;  %v4269_v13 = vld [vmem:[%s6308_s1 + $0x518] ss:$36 sps:$4 sm:$0xff]   ;;  %v4275_v17 = vld [vmem:[%s6308_s1 + $0x560] ss:$36 sps:$4 sm:$0xff]  }
  0x1c   :  { %2774 = vmatprep.subr.bf16.mxu0 %v4197_v28  ;;  %2927 = vmatprep.subr.bf16.mxu1 %v4199_v29  ;;  %v4274_v14 = vld [vmem:[%s6308_s1 + $0x55c] ss:$36 sps:$4 sm:$0xff]   ;;  %v4283_v19 = vld [vmem:[%s6308_s1 + $0x5ac] ss:$36 sps:$4 sm:$0xff]   ;;  %v4289_v23 = vld [vmem:[%s6308_s1 + $0x5f4] ss:$36 sps:$4 sm:$0xff]  }
  0x1d   :  { %v4272_v16 = vld [vmem:[%s6308_s1 + $0x558] ss:$36 sps:$4 sm:$0xff]   ;;  %v4278_v20 = vld [vmem:[%s6308_s1 + $0x5a0] ss:$36 sps:$4 sm:$0xff]   ;;  %v4281_v21 = vld [vmem:[%s6308_s1 + $0x5a8] ss:$36 sps:$4 sm:$0xff]  }
  0x1e   :  { %v4286_v22 = vld [vmem:[%s6308_s1 + $0x5ec] ss:$36 sps:$4 sm:$0xff]   ;;  %v4292_v29 = vld [vmem:[%s6308_s1 + $0x634] ss:$36 sps:$4 sm:$0xff]   ;;  %v4319_v47 = vld [vmem:[%s6308_s1 + $0x75c] ss:$36 sps:$4 sm:$0xff]  }
  0x1f   :  { %2775 = vmatpush1.bf16.msra.mxu0 %v4201_v30  ;;  %2928 = vmatpush1.bf16.msra.mxu1 %v4202_v31  ;;  %v18_v24 = vld [vmem:[%s6309_s0 + $0x30] sm:$0xff]  ;;  %v4284_v26 = vld [vmem:[%s6308_s1 + $0x5e8] ss:$36 sps:$4 sm:$0xff]   ;;  %v4295_v30 = vld [vmem:[%s6308_s1 + $0x63c] ss:$36 sps:$4 sm:$0xff]  }
  0x20   :  { %2776 = vmatprep.subr.bf16.mxu0 %v4203_v32  ;;  %2929 = vmatprep.subr.bf16.mxu1 %v4205_v33  ;;  %v5083_v25 = vcombine.high %v18_v24, %v18_v24  ;;  %v5088_v27 = vcombine.low %v18_v24, %v18_v24  ;;  %v4287_v28 = vld [vmem:[%s6308_s1 + $0x5f0] ss:$36 sps:$4 sm:$0xff]   ;;  %v4293_v32 = vld [vmem:[%s6308_s1 + $0x638] ss:$36 sps:$4 sm:$0xff]   ;;  %v4352_v33 = vld [vmem:[%s6309_s0 + $0xc] ss:$24 sps:$4 sm:$0xff]  }
  0x21   :  { %v4290_v31 = vld [vmem:[%s6308_s1 + $0x630] ss:$36 sps:$4 sm:$0xff]  }
  0x22   :  { %v4453_v24 = vld [vmem:[%s6309_s0 + $0x14] ss:$24 sps:$4 sm:$0xff]  }
  0x23   :  { %2777 = vmatpush1.bf16.msra.mxu0 %v4207_v34  ;;  %2930 = vmatpush1.bf16.msra.mxu1 %v4208_v35  ;;  %v4298_v34 = vld [vmem:[%s6308_s1 + $0x67c] ss:$36 sps:$4 sm:$0xff]   ;;  %v4301_v35 = vld [vmem:[%s6308_s1 + $0x684] ss:$36 sps:$4 sm:$0xff]  }
  0x24   :  { %2778 = vmatprep.subr.bf16.mxu0 %v4209_v36  ;;  %2931 = vmatprep.subr.bf16.mxu1 %v4211_v37  ;;  %v4296_v36 = vld [vmem:[%s6308_s1 + $0x678] ss:$36 sps:$4 sm:$0xff]   ;;  %v4299_v37 = vld [vmem:[%s6308_s1 + $0x680] ss:$36 sps:$4 sm:$0xff]  }
  0x27   :  { %2779 = vmatpush1.bf16.msra.mxu0 %v4213_v38  ;;  %2932 = vmatpush1.bf16.msra.mxu1 %v4214_v39  ;;  %v4304_v38 = vld [vmem:[%s6308_s1 + $0x6c4] ss:$36 sps:$4 sm:$0xff]   ;;  %v4307_v39 = vld [vmem:[%s6308_s1 + $0x6cc] ss:$36 sps:$4 sm:$0xff]  }
  0x28   :  { %2780 = vmatprep.subr.bf16.mxu0 %v4215_v40  ;;  %2933 = vmatprep.subr.bf16.mxu1 %v4217_v41  ;;  %v4302_v40 = vld [vmem:[%s6308_s1 + $0x6c0] ss:$36 sps:$4 sm:$0xff]   ;;  %v4305_v41 = vld [vmem:[%s6308_s1 + $0x6c8] ss:$36 sps:$4 sm:$0xff]  }
  0x2b   :  { %2781 = vmatpush1.bf16.msra.mxu0 %v4219_v42  ;;  %2934 = vmatpush1.bf16.msra.mxu1 %v4220_v43  ;;  %v4310_v42 = vld [vmem:[%s6308_s1 + $0x70c] ss:$36 sps:$4 sm:$0xff]   ;;  %v4313_v43 = vld [vmem:[%s6308_s1 + $0x714] ss:$36 sps:$4 sm:$0xff]  }
  0x2c   :  { %2782 = vmatprep.subr.bf16.mxu0 %v4221_v44  ;;  %2935 = vmatprep.subr.bf16.mxu1 %v4223_v45  ;;  %v4308_v44 = vld [vmem:[%s6308_s1 + $0x708] ss:$36 sps:$4 sm:$0xff]   ;;  %v4311_v45 = vld [vmem:[%s6308_s1 + $0x710] ss:$36 sps:$4 sm:$0xff]  }
  0x2f   :  { %2783 = vmatpush1.bf16.msra.mxu0 %v4225_v46  ;;  %2936 = vmatpush1.bf16.msra.mxu1 %v4226_v48  ;;  %v4316_v46 = vld [vmem:[%s6308_s1 + $0x754] ss:$36 sps:$4 sm:$0xff]  }
  0x30   :  { %2784 = vmatprep.subr.bf16.mxu0 %v4227_v49  ;;  %2937 = vmatprep.subr.bf16.mxu1 %v4229_v50  ;;  %v4314_v48 = vld [vmem:[%s6308_s1 + $0x750] ss:$36 sps:$4 sm:$0xff]   ;;  %v4317_v49 = vld [vmem:[%s6308_s1 + $0x758] ss:$36 sps:$4 sm:$0xff]  }
  0x31   :  { %v4322_v50 = vld [vmem:[%s6308_s1 + $0x79c] ss:$36 sps:$4 sm:$0xff]  }
  0x33   :  { %2785 = vmatpush1.bf16.msra.mxu0 %v4231_v51  ;;  %2938 = vmatpush1.bf16.msra.mxu1 %v4232_v52  ;;  %v4325_v51 = vld [vmem:[%s6308_s1 + $0x7a4] ss:$36 sps:$4 sm:$0xff]   ;;  %v4320_v52 = vld [vmem:[%s6308_s1 + $0x798] ss:$36 sps:$4 sm:$0xff]  }
  0x34   :  { %2786 = vmatprep.subr.bf16.mxu0 %v4233_v53  ;;  %2939 = vmatprep.subr.bf16.mxu1 %v4235_v54  ;;  %v4323_v53 = vld [vmem:[%s6308_s1 + $0x7a0] ss:$36 sps:$4 sm:$0xff]  }
  0x35   :  { %v4328_v54 = vld [vmem:[%s6308_s1 + $0x7e4] ss:$36 sps:$4 sm:$0xff]  }
  0x37   :  { %2787 = vmatpush1.bf16.msra.mxu0 %v4237_v55  ;;  %2940 = vmatpush1.bf16.msra.mxu1 %v4238_v56  ;;  %v4331_v55 = vld [vmem:[%s6308_s1 + $0x7ec] ss:$36 sps:$4 sm:$0xff]   ;;  %v4326_v56 = vld [vmem:[%s6308_s1 + $0x7e0] ss:$36 sps:$4 sm:$0xff]  }
  0x38   :  { %2788 = vmatprep.subr.bf16.mxu0 %v4239_v57  ;;  %2941 = vmatprep.subr.bf16.mxu1 %v4241_v58  ;;  %v4329_v57 = vld [vmem:[%s6308_s1 + $0x7e8] ss:$36 sps:$4 sm:$0xff]  }
  0x39   :  { %v4334_v58 = vld [vmem:[%s6308_s1 + $0x82c] ss:$36 sps:$4 sm:$0xff]  }
  0x3b   :  { %2789 = vmatpush1.bf16.msra.mxu0 %v4243_v59  ;;  %2942 = vmatpush1.bf16.msra.mxu1 %v4244_v60  ;;  %v4337_v59 = vld [vmem:[%s6308_s1 + $0x834] ss:$36 sps:$4 sm:$0xff]   ;;  %v4332_v60 = vld [vmem:[%s6308_s1 + $0x828] ss:$36 sps:$4 sm:$0xff]  }
  0x3c   :  { %2790 = vmatprep.subr.bf16.mxu0 %v4245_v61  ;;  %2943 = vmatprep.subr.bf16.mxu1 %v4247_v62  ;;  %v4335_v61 = vld [vmem:[%s6308_s1 + $0x830] ss:$36 sps:$4 sm:$0xff]  }
  0x3d   :  { %v4341_v62 = vld [vmem:[%s6308_s1 + $0x874] ss:$36 sps:$4 sm:$0xff]  }
  0x3f   :  { %2791 = vmatpush1.bf16.msra.mxu0 %v4249_v63  ;;  %2944 = vmatpush1.bf16.msra.mxu1 %v4250_v0  ;;  %v4344_v63 = vld [vmem:[%s6308_s1 + $0x87c] ss:$36 sps:$4 sm:$0xff]   ;;  %v4339_v0 = vld [vmem:[%s6308_s1 + $0x870] ss:$36 sps:$4 sm:$0xff]  }
  0x40   :  { %2811 = vmatprep.subr.bf16.mxu0 %v4255_v1  ;;  %2964 = vmatprep.subr.bf16.mxu1 %v4258_v2  ;;  %v4342_v1 = vld [vmem:[%s6308_s1 + $0x878] ss:$36 sps:$4 sm:$0xff]  }
  0x41   :  { %v4348_v2 = vld [vmem:[%s6308_s1 + $0x8bc] ss:$36 sps:$4 sm:$0xff]  }
  0x42   :  { %2793 = vmatmul.mubr.bf16.vlgmr.msra.gmra.mrb[0].mxu0 %v4259_v5  ;;  %2946 = vmatmul.mubr.bf16.vlgmr.msra.gmra.mrb[0].mxu1 %v4259_v5  ;;  %v4349_v5 = vld [vmem:[%s6308_s1 + $0x8c0] ss:$36 sps:$4 sm:$0xff]  }
  0x43   :  { %2812 = vmatpush1.bf16.msra.mxu0 %v4253_v3  ;;  %2965 = vmatpush1.bf16.msra.mxu1 %v4256_v4  ;;  %v4351_v3 = vld [vmem:[%s6308_s1 + $0x8c4] ss:$36 sps:$4 sm:$0xff]   ;;  %v4346_v4 = vld [vmem:[%s6308_s1 + $0x8b8] ss:$36 sps:$4 sm:$0xff]  }
  0x44   :  { %2813 = vmatprep.subr.bf16.mxu0 %v4262_v6  ;;  %2966 = vmatprep.subr.bf16.mxu1 %v4265_v7  ;;  %v4356_v6 = vld [vmem:[%s6308_s1 + $0x904] ss:$36 sps:$4 sm:$0xff]   ;;  %v4359_v7 = vld [vmem:[%s6308_s1 + $0x90c] ss:$36 sps:$4 sm:$0xff]  }
  0x45   :  { %2802 = vmatprep.mubr.bf16.mxu0 %v5083_v25  ;;  %2955 = vmatprep.mubr.bf16.mxu1 %v5083_v25 }
  0x47   :  { %2814 = vmatpush1.bf16.msra.mxu0 %v4260_v8  ;;  %2967 = vmatpush1.bf16.msra.mxu1 %v4263_v9  ;;  %v4360_v8 = vld [vmem:[%s6309_s0 + $0x8] ss:$24 sps:$4 sm:$0xff]   ;;  %v19_v9 = vld [vmem:[%s6309_s0 + $0x38] sm:$0xff] }
  0x48   :  { %2815 = vmatprep.subr.bf16.mxu0 %v4268_v10  ;;  %2968 = vmatprep.subr.bf16.mxu1 %v4271_v11  ;;  %v4354_v10 = vld [vmem:[%s6308_s1 + $0x900] ss:$36 sps:$4 sm:$0xff]   ;;  %v4357_v11 = vld [vmem:[%s6308_s1 + $0x908] ss:$36 sps:$4 sm:$0xff]  }
  0x4a   :  { %2803 = vmatmul.mubr.bf16.gmra.mrb[4].mxu0 %v5088_v27  ;;  %2956 = vmatmul.mubr.bf16.gmra.mrb[4].mxu1 %v5088_v27 }
  0x4b   :  { %2816 = vmatpush1.bf16.msra.mxu0 %v4266_v12  ;;  %2969 = vmatpush1.bf16.msra.mxu1 %v4269_v13  ;;  %v4363_v12 = vld [vmem:[%s6308_s1 + $0x94c] ss:$36 sps:$4 sm:$0xff]   ;;  %v4366_v13 = vld [vmem:[%s6308_s1 + $0x954] ss:$36 sps:$4 sm:$0xff]  }
  0x4c   :  { %2817 = vmatprep.subr.bf16.mxu0 %v4274_v14  ;;  %2970 = vmatprep.subr.bf16.mxu1 %v4277_v15  ;;  %v5244_v14 = vcombine.high %v19_v9, %v19_v9  ;;  %v4361_v15 = vld [vmem:[%s6308_s1 + $0x948] ss:$36 sps:$4 sm:$0xff]  }
  0x4d   :  { %2843 = vmatprep.mubr.bf16.mxu0 %v4352_v33  ;;  %2996 = vmatprep.mubr.bf16.mxu1 %v4352_v33  ;;  %v4387_v33 = vld [vmem:[%s6308_s1 + $0xa6c] ss:$36 sps:$4 sm:$0xff]  }
  0x4f   :  { %2818 = vmatpush1.bf16.msra.mxu0 %v4272_v16  ;;  %2971 = vmatpush1.bf16.msra.mxu1 %v4275_v17  ;;  %v4364_v16 = vld [vmem:[%s6308_s1 + $0x950] ss:$36 sps:$4 sm:$0xff]  }
  0x50   :  { %2819 = vmatprep.subr.bf16.mxu0 %v4280_v18  ;;  %2972 = vmatprep.subr.bf16.mxu1 %v4283_v19  ;;  %v4369_v17 = vld [vmem:[%s6308_s1 + $0x994] ss:$36 sps:$4 sm:$0xff]   ;;  %v4372_v18 = vld [vmem:[%s6308_s1 + $0x99c] ss:$36 sps:$4 sm:$0xff]   ;;  %v5260_v19 = vcombine.low %v19_v9, %v19_v9 }
  0x51   :  { %v4449_v9 = vld [vmem:[%s6308_s1 + $0xd3c] ss:$36 sps:$4 sm:$0xff]  }
  0x53   :  { %2820 = vmatpush1.bf16.msra.mxu0 %v4278_v20  ;;  %2973 = vmatpush1.bf16.msra.mxu1 %v4281_v21  ;;  %v4367_v20 = vld [vmem:[%s6308_s1 + $0x990] ss:$36 sps:$4 sm:$0xff]   ;;  %v4370_v21 = vld [vmem:[%s6308_s1 + $0x998] ss:$36 sps:$4 sm:$0xff]  }
  0x54   :  { %2821 = vmatprep.subr.bf16.mxu0 %v4286_v22  ;;  %2974 = vmatprep.subr.bf16.mxu1 %v4289_v23  ;;  %v4375_v22 = vld [vmem:[%s6308_s1 + $0x9dc] ss:$36 sps:$4 sm:$0xff]   ;;  %v4378_v23 = vld [vmem:[%s6308_s1 + $0x9e4] ss:$36 sps:$4 sm:$0xff]  }
  0x57   :  { %2822 = vmatpush1.bf16.msra.mxu0 %v4284_v26  ;;  %2975 = vmatpush1.bf16.msra.mxu1 %v4287_v28  ;;  %v4373_v26 = vld [vmem:[%s6308_s1 + $0x9d8] ss:$36 sps:$4 sm:$0xff]   ;;  %v4376_v28 = vld [vmem:[%s6308_s1 + $0x9e0] ss:$36 sps:$4 sm:$0xff]  }
  0x58   :  { %2823 = vmatprep.subr.bf16.mxu0 %v4292_v29  ;;  %2976 = vmatprep.subr.bf16.mxu1 %v4295_v30  ;;  %v4381_v29 = vld [vmem:[%s6308_s1 + $0xa24] ss:$36 sps:$4 sm:$0xff]   ;;  %v4384_v30 = vld [vmem:[%s6308_s1 + $0xa2c] ss:$36 sps:$4 sm:$0xff]  }
  0x5b   :  { %2824 = vmatpush1.bf16.msra.mxu0 %v4290_v31  ;;  %2977 = vmatpush1.bf16.msra.mxu1 %v4293_v32  ;;  %v4379_v31 = vld [vmem:[%s6308_s1 + $0xa20] ss:$36 sps:$4 sm:$0xff]   ;;  %v4382_v32 = vld [vmem:[%s6308_s1 + $0xa28] ss:$36 sps:$4 sm:$0xff]  }
  0x5c   :  { %2825 = vmatprep.subr.bf16.mxu0 %v4298_v34  ;;  %2978 = vmatprep.subr.bf16.mxu1 %v4301_v35  ;;  %v4390_v34 = vld [vmem:[%s6308_s1 + $0xa74] ss:$36 sps:$4 sm:$0xff]   ;;  %v4385_v35 = vld [vmem:[%s6308_s1 + $0xa68] ss:$36 sps:$4 sm:$0xff]  }
  0x5f   :  { %2826 = vmatpush1.bf16.msra.mxu0 %v4296_v36  ;;  %2979 = vmatpush1.bf16.msra.mxu1 %v4299_v37  ;;  %v4388_v36 = vld [vmem:[%s6308_s1 + $0xa70] ss:$36 sps:$4 sm:$0xff]  }
  0x60   :  { %2827 = vmatprep.subr.bf16.mxu0 %v4304_v38  ;;  %2980 = vmatprep.subr.bf16.mxu1 %v4307_v39  ;;  %v4393_v37 = vld [vmem:[%s6308_s1 + $0xab4] ss:$36 sps:$4 sm:$0xff]   ;;  %v4396_v38 = vld [vmem:[%s6308_s1 + $0xabc] ss:$36 sps:$4 sm:$0xff]  }
  0x61   :  { %v4391_v39 = vld [vmem:[%s6308_s1 + $0xab0] ss:$36 sps:$4 sm:$0xff]  }
  0x63   :  { %2828 = vmatpush1.bf16.msra.mxu0 %v4302_v40  ;;  %2981 = vmatpush1.bf16.msra.mxu1 %v4305_v41  ;;  %v4394_v40 = vld [vmem:[%s6308_s1 + $0xab8] ss:$36 sps:$4 sm:$0xff]  }
  0x64   :  { %2829 = vmatprep.subr.bf16.mxu0 %v4310_v42  ;;  %2982 = vmatprep.subr.bf16.mxu1 %v4313_v43  ;;  %v4399_v41 = vld [vmem:[%s6308_s1 + $0xafc] ss:$36 sps:$4 sm:$0xff]   ;;  %v4402_v42 = vld [vmem:[%s6308_s1 + $0xb04] ss:$36 sps:$4 sm:$0xff]  }
  0x65   :  { %v4397_v43 = vld [vmem:[%s6308_s1 + $0xaf8] ss:$36 sps:$4 sm:$0xff]  }
  0x67   :  { %2830 = vmatpush1.bf16.msra.mxu0 %v4308_v44  ;;  %2983 = vmatpush1.bf16.msra.mxu1 %v4311_v45  ;;  %v4400_v44 = vld [vmem:[%s6308_s1 + $0xb00] ss:$36 sps:$4 sm:$0xff]  }
  0x68   :  { %2831 = vmatprep.subr.bf16.mxu0 %v4316_v46  ;;  %2984 = vmatprep.subr.bf16.mxu1 %v4319_v47  ;;  %v4405_v45 = vld [vmem:[%s6308_s1 + $0xb44] ss:$36 sps:$4 sm:$0xff]   ;;  %v4408_v46 = vld [vmem:[%s6308_s1 + $0xb4c] ss:$36 sps:$4 sm:$0xff]  }
  0x69   :  { %v4403_v47 = vld [vmem:[%s6308_s1 + $0xb40] ss:$36 sps:$4 sm:$0xff]  }
  0x6b   :  { %2832 = vmatpush1.bf16.msra.mxu0 %v4314_v48  ;;  %2985 = vmatpush1.bf16.msra.mxu1 %v4317_v49  ;;  %v4406_v48 = vld [vmem:[%s6308_s1 + $0xb48] ss:$36 sps:$4 sm:$0xff]  }
  0x6c   :  { %2833 = vmatprep.subr.bf16.mxu0 %v4322_v50  ;;  %2986 = vmatprep.subr.bf16.mxu1 %v4325_v51  ;;  %v4411_v49 = vld [vmem:[%s6308_s1 + $0xb8c] ss:$36 sps:$4 sm:$0xff]   ;;  %v4414_v50 = vld [vmem:[%s6308_s1 + $0xb94] ss:$36 sps:$4 sm:$0xff]  }
  0x6d   :  { %v4409_v51 = vld [vmem:[%s6308_s1 + $0xb88] ss:$36 sps:$4 sm:$0xff]  }
  0x6f   :  { %2834 = vmatpush1.bf16.msra.mxu0 %v4320_v52  ;;  %2987 = vmatpush1.bf16.msra.mxu1 %v4323_v53  ;;  %v4412_v52 = vld [vmem:[%s6308_s1 + $0xb90] ss:$36 sps:$4 sm:$0xff]  }
  0x70   :  { %2835 = vmatprep.subr.bf16.mxu0 %v4328_v54  ;;  %2988 = vmatprep.subr.bf16.mxu1 %v4331_v55  ;;  %v4417_v53 = vld [vmem:[%s6308_s1 + $0xbd4] ss:$36 sps:$4 sm:$0xff]   ;;  %v4420_v54 = vld [vmem:[%s6308_s1 + $0xbdc] ss:$36 sps:$4 sm:$0xff]  }
  0x71   :  { %v4415_v55 = vld [vmem:[%s6308_s1 + $0xbd0] ss:$36 sps:$4 sm:$0xff]  }
  0x73   :  { %2836 = vmatpush1.bf16.msra.mxu0 %v4326_v56  ;;  %2989 = vmatpush1.bf16.msra.mxu1 %v4329_v57  ;;  %v4418_v56 = vld [vmem:[%s6308_s1 + $0xbd8] ss:$36 sps:$4 sm:$0xff]  }
  0x74   :  { %2837 = vmatprep.subr.bf16.mxu0 %v4334_v58  ;;  %2990 = vmatprep.subr.bf16.mxu1 %v4337_v59  ;;  %v4423_v57 = vld [vmem:[%s6308_s1 + $0xc1c] ss:$36 sps:$4 sm:$0xff]   ;;  %v4426_v58 = vld [vmem:[%s6308_s1 + $0xc24] ss:$36 sps:$4 sm:$0xff]  }
  0x75   :  { %v4421_v59 = vld [vmem:[%s6308_s1 + $0xc18] ss:$36 sps:$4 sm:$0xff]  }
  0x77   :  { %2838 = vmatpush1.bf16.msra.mxu0 %v4332_v60  ;;  %2991 = vmatpush1.bf16.msra.mxu1 %v4335_v61  ;;  %v4424_v60 = vld [vmem:[%s6308_s1 + $0xc20] ss:$36 sps:$4 sm:$0xff]  }
  0x78   :  { %2839 = vmatprep.subr.bf16.mxu0 %v4341_v62  ;;  %2992 = vmatprep.subr.bf16.mxu1 %v4344_v63  ;;  %v4429_v61 = vld [vmem:[%s6308_s1 + $0xc64] ss:$36 sps:$4 sm:$0xff]   ;;  %v4432_v62 = vld [vmem:[%s6308_s1 + $0xc6c] ss:$36 sps:$4 sm:$0xff]  }
  0x79   :  { %v4427_v63 = vld [vmem:[%s6308_s1 + $0xc60] ss:$36 sps:$4 sm:$0xff]  }
  0x7b   :  { %2840 = vmatpush1.bf16.msra.mxu0 %v4339_v0  ;;  %2993 = vmatpush1.bf16.msra.mxu1 %v4342_v1  ;;  %v4430_v0 = vld [vmem:[%s6308_s1 + $0xc68] ss:$36 sps:$4 sm:$0xff]  }
  0x7c   :  { %2841 = vmatprep.subr.bf16.mxu0 %v4348_v2  ;;  %2994 = vmatprep.subr.bf16.mxu1 %v4351_v3  ;;  %v4435_v1 = vld [vmem:[%s6308_s1 + $0xcac] ss:$36 sps:$4 sm:$0xff]   ;;  %v4438_v2 = vld [vmem:[%s6308_s1 + $0xcb4] ss:$36 sps:$4 sm:$0xff]  }
  0x7d   :  { %v4433_v3 = vld [vmem:[%s6308_s1 + $0xca8] ss:$36 sps:$4 sm:$0xff]  }
  0x7f   :  { %2842 = vmatpush1.bf16.msra.mxu0 %v4346_v4  ;;  %2995 = vmatpush1.bf16.msra.mxu1 %v4349_v5  ;;  %v4436_v4 = vld [vmem:[%s6308_s1 + $0xcb0] ss:$36 sps:$4 sm:$0xff]  }
  0x80   :  { %2862 = vmatprep.subr.bf16.mxu0 %v4356_v6  ;;  %3015 = vmatprep.subr.bf16.mxu1 %v4359_v7  ;;  %v4443_v5 = vld [vmem:[%s6308_s1 + $0xcf4] ss:$36 sps:$4 sm:$0xff]   ;;  %v4446_v6 = vld [vmem:[%s6308_s1 + $0xcfc] ss:$36 sps:$4 sm:$0xff]  }
  0x81   :  { %v4441_v7 = vld [vmem:[%s6308_s1 + $0xcf0] ss:$36 sps:$4 sm:$0xff]  }
  0x82   :  { %2844 = vmatmul.mubr.bf16.vlgmr.msra.gmra.mrb[0].mxu0 %v4360_v8  ;;  %2997 = vmatmul.mubr.bf16.vlgmr.msra.gmra.mrb[0].mxu1 %v4360_v8  ;;  %v4444_v8 = vld [vmem:[%s6308_s1 + $0xcf8] ss:$36 sps:$4 sm:$0xff]  }
  0x83   :  { %2863 = vmatpush1.bf16.msra.mxu0 %v4354_v10  ;;  %3016 = vmatpush1.bf16.msra.mxu1 %v4357_v11  ;;  %v4452_v10 = vld [vmem:[%s6308_s1 + $0xd44] ss:$36 sps:$4 sm:$0xff]   ;;  %v4447_v11 = vld [vmem:[%s6308_s1 + $0xd38] ss:$36 sps:$4 sm:$0xff]  }
  0x84   :  { %2864 = vmatprep.subr.bf16.mxu0 %v4363_v12  ;;  %3017 = vmatprep.subr.bf16.mxu1 %v4366_v13  ;;  %v4450_v12 = vld [vmem:[%s6308_s1 + $0xd40] ss:$36 sps:$4 sm:$0xff]   ;;  %v4458_v13 = vld [vmem:[%s6308_s1 + $0x14] ss:$36 sps:$4 sm:$0xff]  }
  0x85   :  { %2853 = vmatprep.mubr.bf16.mxu0 %v5244_v14  ;;  %3006 = vmatprep.mubr.bf16.mxu1 %v5244_v14 }
  0x87   :  { %2865 = vmatpush1.bf16.msra.mxu0 %v4361_v15  ;;  %3018 = vmatpush1.bf16.msra.mxu1 %v4364_v16  ;;  %v4461_v15 = vld [vmem:[%s6308_s1 + $0x1c] ss:$36 sps:$4 sm:$0xff]   ;;  %v4455_v16 = vld [vmem:[%s6309_s0 + $0x10] ss:$24 sps:$4 sm:$0xff]  }
  0x88   :  { %2866 = vmatprep.subr.bf16.mxu0 %v4369_v17  ;;  %3019 = vmatprep.subr.bf16.mxu1 %v4372_v18  ;;  %v4456_v17 = vld [vmem:[%s6308_s1 + $0x10] ss:$36 sps:$4 sm:$0xff]   ;;  %v20_v18 = vld [vmem:[%s6309_s0 + $0x40] sm:$0xff] }
  0x8a   :  { %2854 = vmatmul.mubr.bf16.gmra.mrb[4].mxu0 %v5260_v19  ;;  %3007 = vmatmul.mubr.bf16.gmra.mrb[4].mxu1 %v5260_v19 }
  0x8b   :  { %2867 = vmatpush1.bf16.msra.mxu0 %v4367_v20  ;;  %3020 = vmatpush1.bf16.msra.mxu1 %v4370_v21  ;;  %v4459_v20 = vld [vmem:[%s6308_s1 + $0x18] ss:$36 sps:$4 sm:$0xff]  }
  0x8c   :  { %2868 = vmatprep.subr.bf16.mxu0 %v4375_v22  ;;  %3021 = vmatprep.subr.bf16.mxu1 %v4378_v23  ;;  %v4464_v21 = vld [vmem:[%s6308_s1 + $0x5c] ss:$36 sps:$4 sm:$0xff]   ;;  %v4467_v22 = vld [vmem:[%s6308_s1 + $0x64] ss:$36 sps:$4 sm:$0xff]   ;;  %v5453_v23 = vcombine.high %v20_v18, %v20_v18 }
  0x8d   :  { %2894 = vmatprep.mubr.bf16.mxu0 %v4453_v24  ;;  %3047 = vmatprep.mubr.bf16.mxu1 %v4453_v24  ;;  %v4462_v24 = vld [vmem:[%s6308_s1 + $0x58] ss:$36 sps:$4 sm:$0xff]  }
  0x8f   :  { %2869 = vmatpush1.bf16.msra.mxu0 %v4373_v26  ;;  %3022 = vmatpush1.bf16.msra.mxu1 %v4376_v28  ;;  %v4465_v26 = vld [vmem:[%s6308_s1 + $0x60] ss:$36 sps:$4 sm:$0xff]  }
  0x90   :  { %2870 = vmatprep.subr.bf16.mxu0 %v4381_v29  ;;  %3023 = vmatprep.subr.bf16.mxu1 %v4384_v30  ;;  %v4472_v28 = vld [vmem:[%s6308_s1 + $0xa4] ss:$36 sps:$4 sm:$0xff]   ;;  %v4475_v29 = vld [vmem:[%s6308_s1 + $0xac] ss:$36 sps:$4 sm:$0xff]   ;;  %v5469_v30 = vcombine.low %v20_v18, %v20_v18 }
  0x91   :  { %v4545_v18 = vld [vmem:[%s6308_s1 + $0x408] ss:$36 sps:$4 sm:$0xff]  }
  0x93   :  { %2871 = vmatpush1.bf16.msra.mxu0 %v4379_v31  ;;  %3024 = vmatpush1.bf16.msra.mxu1 %v4382_v32  ;;  %v4470_v31 = vld [vmem:[%s6308_s1 + $0xa0] ss:$36 sps:$4 sm:$0xff]   ;;  %v4473_v32 = vld [vmem:[%s6308_s1 + $0xa8] ss:$36 sps:$4 sm:$0xff]  }
  0x94   :  { %2872 = vmatprep.subr.bf16.mxu0 %v4387_v33  ;;  %3025 = vmatprep.subr.bf16.mxu1 %v4390_v34  ;;  %v4478_v33 = vld [vmem:[%s6308_s1 + $0xec] ss:$36 sps:$4 sm:$0xff]   ;;  %v4481_v34 = vld [vmem:[%s6308_s1 + $0xf4] ss:$36 sps:$4 sm:$0xff]  }
  0x97   :  { %2873 = vmatpush1.bf16.msra.mxu0 %v4385_v35  ;;  %3026 = vmatpush1.bf16.msra.mxu1 %v4388_v36  ;;  %v4476_v35 = vld [vmem:[%s6308_s1 + $0xe8] ss:$36 sps:$4 sm:$0xff]   ;;  %v4479_v36 = vld [vmem:[%s6308_s1 + $0xf0] ss:$36 sps:$4 sm:$0xff]  }
  0x98   :  { %2874 = vmatprep.subr.bf16.mxu0 %v4393_v37  ;;  %3027 = vmatprep.subr.bf16.mxu1 %v4396_v38  ;;  %v4484_v37 = vld [vmem:[%s6308_s1 + $0x134] ss:$36 sps:$4 sm:$0xff]   ;;  %v4487_v38 = vld [vmem:[%s6308_s1 + $0x13c] ss:$36 sps:$4 sm:$0xff]  }
  0x9b   :  { %2875 = vmatpush1.bf16.msra.mxu0 %v4391_v39  ;;  %3028 = vmatpush1.bf16.msra.mxu1 %v4394_v40  ;;  %v4794_v39 = vld [vmem:[%s6309_s0 + $0x4] ss:$24 sps:$4 sm:$0xff]   ;;  %v4482_v40 = vld [vmem:[%s6308_s1 + $0x130] ss:$36 sps:$4 sm:$0xff]  }
  0x9c   :  { %2876 = vmatprep.subr.bf16.mxu0 %v4399_v41  ;;  %3029 = vmatprep.subr.bf16.mxu1 %v4402_v42  ;;  %v4485_v41 = vld [vmem:[%s6308_s1 + $0x138] ss:$36 sps:$4 sm:$0xff]  }
  0x9d   :  { %v4490_v42 = vld [vmem:[%s6308_s1 + $0x17c] ss:$36 sps:$4 sm:$0xff]  }
  0x9f   :  { %2877 = vmatpush1.bf16.msra.mxu0 %v4397_v43  ;;  %3030 = vmatpush1.bf16.msra.mxu1 %v4400_v44  ;;  %v4493_v43 = vld [vmem:[%s6308_s1 + $0x184] ss:$36 sps:$4 sm:$0xff]   ;;  %v4488_v44 = vld [vmem:[%s6308_s1 + $0x178] ss:$36 sps:$4 sm:$0xff]  }
  0xa0   :  { %2878 = vmatprep.subr.bf16.mxu0 %v4405_v45  ;;  %3031 = vmatprep.subr.bf16.mxu1 %v4408_v46  ;;  %v4491_v45 = vld [vmem:[%s6308_s1 + $0x180] ss:$36 sps:$4 sm:$0xff]  }
  0xa1   :  { %v4496_v46 = vld [vmem:[%s6308_s1 + $0x1c4] ss:$36 sps:$4 sm:$0xff]  }
  0xa3   :  { %2879 = vmatpush1.bf16.msra.mxu0 %v4403_v47  ;;  %3032 = vmatpush1.bf16.msra.mxu1 %v4406_v48  ;;  %v4499_v47 = vld [vmem:[%s6308_s1 + $0x1cc] ss:$36 sps:$4 sm:$0xff]   ;;  %v4494_v48 = vld [vmem:[%s6308_s1 + $0x1c0] ss:$36 sps:$4 sm:$0xff]  }
  0xa4   :  { %2880 = vmatprep.subr.bf16.mxu0 %v4411_v49  ;;  %3033 = vmatprep.subr.bf16.mxu1 %v4414_v50  ;;  %v4497_v49 = vld [vmem:[%s6308_s1 + $0x1c8] ss:$36 sps:$4 sm:$0xff]  }
  0xa5   :  { %v4502_v50 = vld [vmem:[%s6308_s1 + $0x20c] ss:$36 sps:$4 sm:$0xff]  }
  0xa7   :  { %2881 = vmatpush1.bf16.msra.mxu0 %v4409_v51  ;;  %3034 = vmatpush1.bf16.msra.mxu1 %v4412_v52  ;;  %v4505_v51 = vld [vmem:[%s6308_s1 + $0x214] ss:$36 sps:$4 sm:$0xff]   ;;  %v4500_v52 = vld [vmem:[%s6308_s1 + $0x208] ss:$36 sps:$4 sm:$0xff]  }
  0xa8   :  { %2882 = vmatprep.subr.bf16.mxu0 %v4417_v53  ;;  %3035 = vmatprep.subr.bf16.mxu1 %v4420_v54  ;;  %v4503_v53 = vld [vmem:[%s6308_s1 + $0x210] ss:$36 sps:$4 sm:$0xff]  }
  0xa9   :  { %v4508_v54 = vld [vmem:[%s6308_s1 + $0x254] ss:$36 sps:$4 sm:$0xff]  }
  0xab   :  { %2883 = vmatpush1.bf16.msra.mxu0 %v4415_v55  ;;  %3036 = vmatpush1.bf16.msra.mxu1 %v4418_v56  ;;  %v4511_v55 = vld [vmem:[%s6308_s1 + $0x25c] ss:$36 sps:$4 sm:$0xff]   ;;  %v4506_v56 = vld [vmem:[%s6308_s1 + $0x250] ss:$36 sps:$4 sm:$0xff]  }
  0xac   :  { %2884 = vmatprep.subr.bf16.mxu0 %v4423_v57  ;;  %3037 = vmatprep.subr.bf16.mxu1 %v4426_v58  ;;  %v4509_v57 = vld [vmem:[%s6308_s1 + $0x258] ss:$36 sps:$4 sm:$0xff]  }
  0xad   :  { %v4514_v58 = vld [vmem:[%s6308_s1 + $0x29c] ss:$36 sps:$4 sm:$0xff]  }
  0xaf   :  { %2885 = vmatpush1.bf16.msra.mxu0 %v4421_v59  ;;  %3038 = vmatpush1.bf16.msra.mxu1 %v4424_v60  ;;  %v4517_v59 = vld [vmem:[%s6308_s1 + $0x2a4] ss:$36 sps:$4 sm:$0xff]   ;;  %v4512_v60 = vld [vmem:[%s6308_s1 + $0x298] ss:$36 sps:$4 sm:$0xff]  }
  0xb0   :  { %2886 = vmatprep.subr.bf16.mxu0 %v4429_v61  ;;  %3039 = vmatprep.subr.bf16.mxu1 %v4432_v62  ;;  %v4515_v61 = vld [vmem:[%s6308_s1 + $0x2a0] ss:$36 sps:$4 sm:$0xff]  }
  0xb1   :  { %v4520_v62 = vld [vmem:[%s6308_s1 + $0x2e4] ss:$36 sps:$4 sm:$0xff]  }
  0xb3   :  { %2887 = vmatpush1.bf16.msra.mxu0 %v4427_v63  ;;  %3040 = vmatpush1.bf16.msra.mxu1 %v4430_v0  ;;  %v4523_v63 = vld [vmem:[%s6308_s1 + $0x2ec] ss:$36 sps:$4 sm:$0xff]   ;;  %v4518_v0 = vld [vmem:[%s6308_s1 + $0x2e0] ss:$36 sps:$4 sm:$0xff]  }
  0xb4   :  { %2888 = vmatprep.subr.bf16.mxu0 %v4435_v1  ;;  %3041 = vmatprep.subr.bf16.mxu1 %v4438_v2  ;;  %v4521_v1 = vld [vmem:[%s6308_s1 + $0x2e8] ss:$36 sps:$4 sm:$0xff]  }
  0xb5   :  { %v4526_v2 = vld [vmem:[%s6308_s1 + $0x32c] ss:$36 sps:$4 sm:$0xff]  }
  0xb7   :  { %2889 = vmatpush1.bf16.msra.mxu0 %v4433_v3  ;;  %3042 = vmatpush1.bf16.msra.mxu1 %v4436_v4  ;;  %v4529_v3 = vld [vmem:[%s6308_s1 + $0x334] ss:$36 sps:$4 sm:$0xff]   ;;  %v4524_v4 = vld [vmem:[%s6308_s1 + $0x328] ss:$36 sps:$4 sm:$0xff]  }
  0xb8   :  { %2890 = vmatprep.subr.bf16.mxu0 %v4443_v5  ;;  %3043 = vmatprep.subr.bf16.mxu1 %v4446_v6  ;;  %v4527_v5 = vld [vmem:[%s6308_s1 + $0x330] ss:$36 sps:$4 sm:$0xff]  }
  0xb9   :  { %v4532_v6 = vld [vmem:[%s6308_s1 + $0x374] ss:$36 sps:$4 sm:$0xff]  }
  0xbb   :  { %2891 = vmatpush1.bf16.msra.mxu0 %v4441_v7  ;;  %3044 = vmatpush1.bf16.msra.mxu1 %v4444_v8  ;;  %v4535_v7 = vld [vmem:[%s6308_s1 + $0x37c] ss:$36 sps:$4 sm:$0xff]   ;;  %v4530_v8 = vld [vmem:[%s6308_s1 + $0x370] ss:$36 sps:$4 sm:$0xff]  }
  0xbc   :  { %2892 = vmatprep.subr.bf16.mxu0 %v4449_v9  ;;  %3045 = vmatprep.subr.bf16.mxu1 %v4452_v10  ;;  %v4533_v9 = vld [vmem:[%s6308_s1 + $0x378] ss:$36 sps:$4 sm:$0xff]  }
  0xbd   :  { %v4538_v10 = vld [vmem:[%s6308_s1 + $0x3bc] ss:$36 sps:$4 sm:$0xff]  }
  0xbf   :  { %2893 = vmatpush1.bf16.msra.mxu0 %v4447_v11  ;;  %3046 = vmatpush1.bf16.msra.mxu1 %v4450_v12  ;;  %v4541_v11 = vld [vmem:[%s6308_s1 + $0x3c4] ss:$36 sps:$4 sm:$0xff]   ;;  %v4536_v12 = vld [vmem:[%s6308_s1 + $0x3b8] ss:$36 sps:$4 sm:$0xff]  }
  0xc0   :  { %3066 = vmatprep.subr.bf16.mxu0 %v4458_v13  ;;  %3219 = vmatprep.subr.bf16.mxu1 %v4461_v15  ;;  %v4539_v13 = vld [vmem:[%s6308_s1 + $0x3c0] ss:$36 sps:$4 sm:$0xff]  }
  0xc1   :  { %v4544_v15 = vld [vmem:[%s6308_s1 + $0x404] ss:$36 sps:$4 sm:$0xff]  }
  0xc2   :  { %2895 = vmatmul.mubr.bf16.vlgmr.msra.gmra.mrb[0].mxu0 %v4455_v16  ;;  %3048 = vmatmul.mubr.bf16.vlgmr.msra.gmra.mrb[0].mxu1 %v4455_v16  ;;  %v4547_v16 = vld [vmem:[%s6308_s1 + $0x40c] ss:$36 sps:$4 sm:$0xff]  }
  0xc3   :  { %3067 = vmatpush1.bf16.msra.mxu0 %v4456_v17  ;;  %3220 = vmatpush1.bf16.msra.mxu1 %v4459_v20  ;;  %v4542_v17 = vld [vmem:[%s6308_s1 + $0x400] ss:$36 sps:$4 sm:$0xff]   ;;  %v4550_v20 = vld [vmem:[%s6308_s1 + $0x44c] ss:$36 sps:$4 sm:$0xff]  }
  0xc4   :  { %3068 = vmatprep.subr.bf16.mxu0 %v4464_v21  ;;  %3221 = vmatprep.subr.bf16.mxu1 %v4467_v22  ;;  %v4553_v21 = vld [vmem:[%s6308_s1 + $0x454] ss:$36 sps:$4 sm:$0xff]   ;;  %v4548_v22 = vld [vmem:[%s6308_s1 + $0x448] ss:$36 sps:$4 sm:$0xff]  }
  0xc5   :  { %2904 = vmatprep.mubr.bf16.mxu0 %v5453_v23  ;;  %3057 = vmatprep.mubr.bf16.mxu1 %v5453_v23 }
  0xc7   :  { %3069 = vmatpush1.bf16.msra.mxu0 %v4462_v24  ;;  %3222 = vmatpush1.bf16.msra.mxu1 %v4465_v26  ;;  %v4551_v24 = vld [vmem:[%s6308_s1 + $0x450] ss:$36 sps:$4 sm:$0xff]  }
  0xc8   :  { %3070 = vmatprep.subr.bf16.mxu0 %v4472_v28  ;;  %3223 = vmatprep.subr.bf16.mxu1 %v4475_v29  ;;  %v4556_v26 = vld [vmem:[%s6308_s1 + $0x494] ss:$36 sps:$4 sm:$0xff]   ;;  %v4559_v28 = vld [vmem:[%s6308_s1 + $0x49c] ss:$36 sps:$4 sm:$0xff]  }
  0xc9   :  { %v4554_v29 = vld [vmem:[%s6308_s1 + $0x490] ss:$36 sps:$4 sm:$0xff]  }
  0xca   :  { %2905 = vmatmul.mubr.bf16.gmra.mrb[4].mxu0 %v5469_v30  ;;  %3058 = vmatmul.mubr.bf16.gmra.mrb[4].mxu1 %v5469_v30 }
  0xcb   :  { %3071 = vmatpush1.bf16.msra.mxu0 %v4470_v31  ;;  %3224 = vmatpush1.bf16.msra.mxu1 %v4473_v32  ;;  %v4557_v31 = vld [vmem:[%s6308_s1 + $0x498] ss:$36 sps:$4 sm:$0xff]  }
  0xcc   :  { %3072 = vmatprep.subr.bf16.mxu0 %v4478_v33  ;;  %3225 = vmatprep.subr.bf16.mxu1 %v4481_v34  ;;  %v4562_v32 = vld [vmem:[%s6308_s1 + $0x4dc] ss:$36 sps:$4 sm:$0xff]   ;;  %v4565_v33 = vld [vmem:[%s6308_s1 + $0x4e4] ss:$36 sps:$4 sm:$0xff]  }
  0xcd   :  { %3098 = vmatprep.mubr.bf16.mxu0 %v4794_v39  ;;  %3251 = vmatprep.mubr.bf16.mxu1 %v4794_v39  ;;  %v5659_v34 = vld [vmem:[%s6309_s0] ss:$24 sps:$4 sm:$0xff]  }
  0xce   :  { %v4566_v39 = vld [vmem:[%s6308_s1 + $0x520] ss:$36 sps:$4 sm:$0xff]  }
  0xcf   :  { %3073 = vmatpush1.bf16.msra.mxu0 %v4476_v35  ;;  %3226 = vmatpush1.bf16.msra.mxu1 %v4479_v36  ;;  %v4560_v35 = vld [vmem:[%s6308_s1 + $0x4d8] ss:$36 sps:$4 sm:$0xff]   ;;  %v4563_v36 = vld [vmem:[%s6308_s1 + $0x4e0] ss:$36 sps:$4 sm:$0xff]  }
  0xd0   :  { %3074 = vmatprep.subr.bf16.mxu0 %v4484_v37  ;;  %3227 = vmatprep.subr.bf16.mxu1 %v4487_v38  ;;  %v4568_v37 = vld [vmem:[%s6308_s1 + $0x524] ss:$36 sps:$4 sm:$0xff]   ;;  %v4571_v38 = vld [vmem:[%s6308_s1 + $0x52c] ss:$36 sps:$4 sm:$0xff]  }
  0xd3   :  { %3075 = vmatpush1.bf16.msra.mxu0 %v4482_v40  ;;  %3228 = vmatpush1.bf16.msra.mxu1 %v4485_v41  ;;  %v4569_v40 = vld [vmem:[%s6308_s1 + $0x528] ss:$36 sps:$4 sm:$0xff]  }
  0xd4   :  { %3076 = vmatprep.subr.bf16.mxu0 %v4490_v42  ;;  %3229 = vmatprep.subr.bf16.mxu1 %v4493_v43  ;;  %v4574_v41 = vld [vmem:[%s6308_s1 + $0x56c] ss:$36 sps:$4 sm:$0xff]   ;;  %v4577_v42 = vld [vmem:[%s6308_s1 + $0x574] ss:$36 sps:$4 sm:$0xff]  }
  0xd5   :  { %v4572_v43 = vld [vmem:[%s6308_s1 + $0x568] ss:$36 sps:$4 sm:$0xff]  }
  0xd7   :  { %3077 = vmatpush1.bf16.msra.mxu0 %v4488_v44  ;;  %3230 = vmatpush1.bf16.msra.mxu1 %v4491_v45  ;;  %v4575_v44 = vld [vmem:[%s6308_s1 + $0x570] ss:$36 sps:$4 sm:$0xff]  }
  0xd8   :  { %3078 = vmatprep.subr.bf16.mxu0 %v4496_v46  ;;  %3231 = vmatprep.subr.bf16.mxu1 %v4499_v47  ;;  %v4580_v45 = vld [vmem:[%s6308_s1 + $0x5b4] ss:$36 sps:$4 sm:$0xff]   ;;  %v4583_v46 = vld [vmem:[%s6308_s1 + $0x5bc] ss:$36 sps:$4 sm:$0xff]  }
  0xd9   :  { %v4578_v47 = vld [vmem:[%s6308_s1 + $0x5b0] ss:$36 sps:$4 sm:$0xff]  }
  0xdb   :  { %3079 = vmatpush1.bf16.msra.mxu0 %v4494_v48  ;;  %3232 = vmatpush1.bf16.msra.mxu1 %v4497_v49  ;;  %v5709_v48 = vld [vmem:[%s6309_s0 + $0xc] ss:$24 sps:$4 sm:$0xff]   ;;  %v4581_v49 = vld [vmem:[%s6308_s1 + $0x5b8] ss:$36 sps:$4 sm:$0xff]  }
  0xdc   :  { %3080 = vmatprep.subr.bf16.mxu0 %v4502_v50  ;;  %3233 = vmatprep.subr.bf16.mxu1 %v4505_v51  ;;  %v4586_v50 = vld [vmem:[%s6308_s1 + $0x5fc] ss:$36 sps:$4 sm:$0xff]   ;;  %v4589_v51 = vld [vmem:[%s6308_s1 + $0x604] ss:$36 sps:$4 sm:$0xff]  }
  0xdf   :  { %3081 = vmatpush1.bf16.msra.mxu0 %v4500_v52  ;;  %3234 = vmatpush1.bf16.msra.mxu1 %v4503_v53  ;;  %v4584_v52 = vld [vmem:[%s6308_s1 + $0x5f8] ss:$36 sps:$4 sm:$0xff]   ;;  %v4587_v53 = vld [vmem:[%s6308_s1 + $0x600] ss:$36 sps:$4 sm:$0xff]  }
  0xe0   :  { %3082 = vmatprep.subr.bf16.mxu0 %v4508_v54  ;;  %3235 = vmatprep.subr.bf16.mxu1 %v4511_v55  ;;  %v4592_v54 = vld [vmem:[%s6308_s1 + $0x644] ss:$36 sps:$4 sm:$0xff]   ;;  %v4595_v55 = vld [vmem:[%s6308_s1 + $0x64c] ss:$36 sps:$4 sm:$0xff]  }
  0xe3   :  { %3083 = vmatpush1.bf16.msra.mxu0 %v4506_v56  ;;  %3236 = vmatpush1.bf16.msra.mxu1 %v4509_v57  ;;  %v4590_v56 = vld [vmem:[%s6308_s1 + $0x640] ss:$36 sps:$4 sm:$0xff]   ;;  %v4593_v57 = vld [vmem:[%s6308_s1 + $0x648] ss:$36 sps:$4 sm:$0xff]  }
  0xe4   :  { %3084 = vmatprep.subr.bf16.mxu0 %v4514_v58  ;;  %3237 = vmatprep.subr.bf16.mxu1 %v4517_v59  ;;  %v4598_v58 = vld [vmem:[%s6308_s1 + $0x68c] ss:$36 sps:$4 sm:$0xff]   ;;  %v4601_v59 = vld [vmem:[%s6308_s1 + $0x694] ss:$36 sps:$4 sm:$0xff]  }
  0xe7   :  { %3085 = vmatpush1.bf16.msra.mxu0 %v4512_v60  ;;  %3238 = vmatpush1.bf16.msra.mxu1 %v4515_v61  ;;  %v4596_v60 = vld [vmem:[%s6308_s1 + $0x688] ss:$36 sps:$4 sm:$0xff]   ;;  %v4599_v61 = vld [vmem:[%s6308_s1 + $0x690] ss:$36 sps:$4 sm:$0xff]  }
  0xe8   :  { %3086 = vmatprep.subr.bf16.mxu0 %v4520_v62  ;;  %3239 = vmatprep.subr.bf16.mxu1 %v4523_v63  ;;  %v4604_v62 = vld [vmem:[%s6308_s1 + $0x6d4] ss:$36 sps:$4 sm:$0xff]   ;;  %v4607_v63 = vld [vmem:[%s6308_s1 + $0x6dc] ss:$36 sps:$4 sm:$0xff]  }
  0xeb   :  { %3087 = vmatpush1.bf16.msra.mxu0 %v4518_v0  ;;  %3240 = vmatpush1.bf16.msra.mxu1 %v4521_v1  ;;  %v4602_v0 = vld [vmem:[%s6308_s1 + $0x6d0] ss:$36 sps:$4 sm:$0xff]   ;;  %v4605_v1 = vld [vmem:[%s6308_s1 + $0x6d8] ss:$36 sps:$4 sm:$0xff]  }
  0xec   :  { %3088 = vmatprep.subr.bf16.mxu0 %v4526_v2  ;;  %3241 = vmatprep.subr.bf16.mxu1 %v4529_v3  ;;  %v4610_v2 = vld [vmem:[%s6308_s1 + $0x71c] ss:$36 sps:$4 sm:$0xff]   ;;  %v4613_v3 = vld [vmem:[%s6308_s1 + $0x724] ss:$36 sps:$4 sm:$0xff]  }
  0xef   :  { %3089 = vmatpush1.bf16.msra.mxu0 %v4524_v4  ;;  %3242 = vmatpush1.bf16.msra.mxu1 %v4527_v5  ;;  %v4608_v4 = vld [vmem:[%s6308_s1 + $0x718] ss:$36 sps:$4 sm:$0xff]   ;;  %v4611_v5 = vld [vmem:[%s6308_s1 + $0x720] ss:$36 sps:$4 sm:$0xff]  }
  0xf0   :  { %3090 = vmatprep.subr.bf16.mxu0 %v4532_v6  ;;  %3243 = vmatprep.subr.bf16.mxu1 %v4535_v7  ;;  %v4616_v6 = vld [vmem:[%s6308_s1 + $0x764] ss:$36 sps:$4 sm:$0xff]   ;;  %v4619_v7 = vld [vmem:[%s6308_s1 + $0x76c] ss:$36 sps:$4 sm:$0xff]  }
  0xf3   :  { %3091 = vmatpush1.bf16.msra.mxu0 %v4530_v8  ;;  %3244 = vmatpush1.bf16.msra.mxu1 %v4533_v9  ;;  %v4614_v8 = vld [vmem:[%s6308_s1 + $0x760] ss:$36 sps:$4 sm:$0xff]   ;;  %v4617_v9 = vld [vmem:[%s6308_s1 + $0x768] ss:$36 sps:$4 sm:$0xff]  }
  0xf4   :  { %3092 = vmatprep.subr.bf16.mxu0 %v4538_v10  ;;  %3245 = vmatprep.subr.bf16.mxu1 %v4541_v11  ;;  %v4622_v10 = vld [vmem:[%s6308_s1 + $0x7ac] ss:$36 sps:$4 sm:$0xff]   ;;  %v4625_v11 = vld [vmem:[%s6308_s1 + $0x7b4] ss:$36 sps:$4 sm:$0xff]  }
  0xf7   :  { %3093 = vmatpush1.bf16.msra.mxu0 %v4536_v12  ;;  %3246 = vmatpush1.bf16.msra.mxu1 %v4539_v13  ;;  %v4620_v12 = vld [vmem:[%s6308_s1 + $0x7a8] ss:$36 sps:$4 sm:$0xff]   ;;  %v4623_v13 = vld [vmem:[%s6308_s1 + $0x7b0] ss:$36 sps:$4 sm:$0xff]  }
  0xf8   :  { %3094 = vmatprep.subr.bf16.mxu0 %v4544_v15  ;;  %3247 = vmatprep.subr.bf16.mxu1 %v4547_v16  ;;  %v4628_v15 = vld [vmem:[%s6308_s1 + $0x7f4] ss:$36 sps:$4 sm:$0xff]   ;;  %v4631_v16 = vld [vmem:[%s6308_s1 + $0x7fc] ss:$36 sps:$4 sm:$0xff]  }
  0xfb   :  { %3095 = vmatpush1.bf16.msra.mxu0 %v4542_v17  ;;  %3248 = vmatpush1.bf16.msra.mxu1 %v4545_v18  ;;  %v4626_v17 = vld [vmem:[%s6308_s1 + $0x7f0] ss:$36 sps:$4 sm:$0xff]   ;;  %v4629_v18 = vld [vmem:[%s6308_s1 + $0x7f8] ss:$36 sps:$4 sm:$0xff]  }
  0xfc   :  { %3096 = vmatprep.subr.bf16.mxu0 %v4550_v20  ;;  %3249 = vmatprep.subr.bf16.mxu1 %v4553_v21  ;;  %v4634_v20 = vld [vmem:[%s6308_s1 + $0x83c] ss:$36 sps:$4 sm:$0xff]   ;;  %v4637_v21 = vld [vmem:[%s6308_s1 + $0x844] ss:$36 sps:$4 sm:$0xff]  }
  0xff   :  { %3097 = vmatpush1.bf16.msra.mxu0 %v4548_v22  ;;  %3250 = vmatpush1.bf16.msra.mxu1 %v4551_v24  ;;  %v4632_v22 = vld [vmem:[%s6308_s1 + $0x838] ss:$36 sps:$4 sm:$0xff]   ;;  %v4635_v24 = vld [vmem:[%s6308_s1 + $0x840] ss:$36 sps:$4 sm:$0xff]  }
 0x100   :  { %3117 = vmatprep.subr.bf16.mxu0 %v4556_v26  ;;  %3270 = vmatprep.subr.bf16.mxu1 %v4559_v28  ;;  %v4640_v26 = vld [vmem:[%s6308_s1 + $0x884] ss:$36 sps:$4 sm:$0xff]   ;;  %v4643_v28 = vld [vmem:[%s6308_s1 + $0x88c] ss:$36 sps:$4 sm:$0xff]  }
 0x102   :  { %3099 = vmatmul.mubr.bf16.vlgmr.msra.gmra.mrb[8].mxu0 %v5659_v34  ;;  %3252 = vmatmul.mubr.bf16.vlgmr.msra.gmra.mrb[8].mxu1 %v5659_v34 }
 0x103   :  { %3118 = vmatpush1.bf16.msra.mxu0 %v4554_v29  ;;  %3271 = vmatpush1.bf16.msra.mxu1 %v4557_v31  ;;  %v4638_v29 = vld [vmem:[%s6308_s1 + $0x880] ss:$36 sps:$4 sm:$0xff]   ;;  %v4641_v31 = vld [vmem:[%s6308_s1 + $0x888] ss:$36 sps:$4 sm:$0xff]  }
 0x104   :  { %3119 = vmatprep.subr.bf16.mxu0 %v4562_v32  ;;  %3272 = vmatprep.subr.bf16.mxu1 %v4565_v33  ;;  %v4646_v32 = vld [vmem:[%s6308_s1 + $0x8cc] ss:$36 sps:$4 sm:$0xff]   ;;  %v4649_v33 = vld [vmem:[%s6308_s1 + $0x8d4] ss:$36 sps:$4 sm:$0xff]  }
 0x105   :  { %3108 = vmatprep.mubr.bf16.mxu0 %v5083_v25  ;;  %3261 = vmatprep.mubr.bf16.mxu1 %v5083_v25 }
 0x107   :  { %3120 = vmatpush1.bf16.msra.mxu0 %v4560_v35  ;;  %3273 = vmatpush1.bf16.msra.mxu1 %v4563_v36  ;;  %v4644_v35 = vld [vmem:[%s6308_s1 + $0x8c8] ss:$36 sps:$4 sm:$0xff]   ;;  %v4647_v36 = vld [vmem:[%s6308_s1 + $0x8d0] ss:$36 sps:$4 sm:$0xff]  }
 0x108   :  { %3121 = vmatprep.subr.bf16.mxu0 %v4568_v37  ;;  %3274 = vmatprep.subr.bf16.mxu1 %v4571_v38  ;;  %v4652_v37 = vld [vmem:[%s6308_s1 + $0x914] ss:$36 sps:$4 sm:$0xff]   ;;  %v4655_v38 = vld [vmem:[%s6308_s1 + $0x91c] ss:$36 sps:$4 sm:$0xff]  }
 0x10a   :  { %3109 = vmatmul.mubr.bf16.gmra.mrb[12].mxu0 %v5088_v27  ;;  %3262 = vmatmul.mubr.bf16.gmra.mrb[12].mxu1 %v5088_v27 }
 0x10b   :  { %3122 = vmatpush1.bf16.msra.mxu0 %v4566_v39  ;;  %3275 = vmatpush1.bf16.msra.mxu1 %v4569_v40  ;;  %v4650_v39 = vld [vmem:[%s6308_s1 + $0x910] ss:$36 sps:$4 sm:$0xff]   ;;  %v4653_v40 = vld [vmem:[%s6308_s1 + $0x918] ss:$36 sps:$4 sm:$0xff]  }
 0x10c   :  { %3123 = vmatprep.subr.bf16.mxu0 %v4574_v41  ;;  %3276 = vmatprep.subr.bf16.mxu1 %v4577_v42  ;;  %v4658_v41 = vld [vmem:[%s6308_s1 + $0x95c] ss:$36 sps:$4 sm:$0xff]   ;;  %v4661_v42 = vld [vmem:[%s6308_s1 + $0x964] ss:$36 sps:$4 sm:$0xff]  }
 0x10d   :  { %3149 = vmatprep.mubr.bf16.mxu0 %v5709_v48  ;;  %3302 = vmatprep.mubr.bf16.mxu1 %v5709_v48 }
 0x10f   :  { %3124 = vmatpush1.bf16.msra.mxu0 %v4572_v43  ;;  %3277 = vmatpush1.bf16.msra.mxu1 %v4575_v44  ;;  %v5869_v43 = vld [vmem:[%s6309_s0 + $0x8] ss:$24 sps:$4 sm:$0xff]   ;;  %v4656_v44 = vld [vmem:[%s6308_s1 + $0x958] ss:$36 sps:$4 sm:$0xff]  }
 0x110   :  { %3125 = vmatprep.subr.bf16.mxu0 %v4580_v45  ;;  %3278 = vmatprep.subr.bf16.mxu1 %v4583_v46  ;;  %v4659_v45 = vld [vmem:[%s6308_s1 + $0x960] ss:$36 sps:$4 sm:$0xff]  }
 0x111   :  { %v4664_v46 = vld [vmem:[%s6308_s1 + $0x9a4] ss:$36 sps:$4 sm:$0xff]  }
 0x113   :  { %3126 = vmatpush1.bf16.msra.mxu0 %v4578_v47  ;;  %3279 = vmatpush1.bf16.msra.mxu1 %v4581_v49  ;;  %v4667_v47 = vld [vmem:[%s6308_s1 + $0x9ac] ss:$36 sps:$4 sm:$0xff]   ;;  %v4662_v49 = vld [vmem:[%s6308_s1 + $0x9a0] ss:$36 sps:$4 sm:$0xff]  }
 0x114   :  { %3127 = vmatprep.subr.bf16.mxu0 %v4586_v50  ;;  %3280 = vmatprep.subr.bf16.mxu1 %v4589_v51  ;;  %v4665_v50 = vld [vmem:[%s6308_s1 + $0x9a8] ss:$36 sps:$4 sm:$0xff]  }
 0x115   :  { %v4670_v51 = vld [vmem:[%s6308_s1 + $0x9ec] ss:$36 sps:$4 sm:$0xff]  }
 0x117   :  { %3128 = vmatpush1.bf16.msra.mxu0 %v4584_v52  ;;  %3281 = vmatpush1.bf16.msra.mxu1 %v4587_v53  ;;  %v4673_v52 = vld [vmem:[%s6308_s1 + $0x9f4] ss:$36 sps:$4 sm:$0xff]   ;;  %v4668_v53 = vld [vmem:[%s6308_s1 + $0x9e8] ss:$36 sps:$4 sm:$0xff]  }
 0x118   :  { %3129 = vmatprep.subr.bf16.mxu0 %v4592_v54  ;;  %3282 = vmatprep.subr.bf16.mxu1 %v4595_v55  ;;  %v4671_v54 = vld [vmem:[%s6308_s1 + $0x9f0] ss:$36 sps:$4 sm:$0xff]  }
 0x119   :  { %v4676_v55 = vld [vmem:[%s6308_s1 + $0xa34] ss:$36 sps:$4 sm:$0xff]  }
 0x11b   :  { %3130 = vmatpush1.bf16.msra.mxu0 %v4590_v56  ;;  %3283 = vmatpush1.bf16.msra.mxu1 %v4593_v57  ;;  %v4679_v56 = vld [vmem:[%s6308_s1 + $0xa3c] ss:$36 sps:$4 sm:$0xff]   ;;  %v5916_v57 = vld [vmem:[%s6309_s0 + $0x14] ss:$24 sps:$4 sm:$0xff]  }
 0x11c   :  { %3131 = vmatprep.subr.bf16.mxu0 %v4598_v58  ;;  %3284 = vmatprep.subr.bf16.mxu1 %v4601_v59  ;;  %v4674_v58 = vld [vmem:[%s6308_s1 + $0xa30] ss:$36 sps:$4 sm:$0xff]   ;;  %v4677_v59 = vld [vmem:[%s6308_s1 + $0xa38] ss:$36 sps:$4 sm:$0xff]  }
 0x11f   :  { %3132 = vmatpush1.bf16.msra.mxu0 %v4596_v60  ;;  %3285 = vmatpush1.bf16.msra.mxu1 %v4599_v61  ;;  %v4682_v60 = vld [vmem:[%s6308_s1 + $0xa7c] ss:$36 sps:$4 sm:$0xff]   ;;  %v4685_v61 = vld [vmem:[%s6308_s1 + $0xa84] ss:$36 sps:$4 sm:$0xff]  }
 0x120   :  { %3133 = vmatprep.subr.bf16.mxu0 %v4604_v62  ;;  %3286 = vmatprep.subr.bf16.mxu1 %v4607_v63  ;;  %v4680_v62 = vld [vmem:[%s6308_s1 + $0xa78] ss:$36 sps:$4 sm:$0xff]   ;;  %v4683_v63 = vld [vmem:[%s6308_s1 + $0xa80] ss:$36 sps:$4 sm:$0xff]  }
 0x123   :  { %3134 = vmatpush1.bf16.msra.mxu0 %v4602_v0  ;;  %3287 = vmatpush1.bf16.msra.mxu1 %v4605_v1  ;;  %v4688_v0 = vld [vmem:[%s6308_s1 + $0xac4] ss:$36 sps:$4 sm:$0xff]   ;;  %v4691_v1 = vld [vmem:[%s6308_s1 + $0xacc] ss:$36 sps:$4 sm:$0xff]  }
 0x124   :  { %3135 = vmatprep.subr.bf16.mxu0 %v4610_v2  ;;  %3288 = vmatprep.subr.bf16.mxu1 %v4613_v3  ;;  %v4686_v2 = vld [vmem:[%s6308_s1 + $0xac0] ss:$36 sps:$4 sm:$0xff]   ;;  %v4689_v3 = vld [vmem:[%s6308_s1 + $0xac8] ss:$36 sps:$4 sm:$0xff]  }
 0x127   :  { %3136 = vmatpush1.bf16.msra.mxu0 %v4608_v4  ;;  %3289 = vmatpush1.bf16.msra.mxu1 %v4611_v5  ;;  %v4694_v4 = vld [vmem:[%s6308_s1 + $0xb0c] ss:$36 sps:$4 sm:$0xff]   ;;  %v4697_v5 = vld [vmem:[%s6308_s1 + $0xb14] ss:$36 sps:$4 sm:$0xff]  }
 0x128   :  { %3137 = vmatprep.subr.bf16.mxu0 %v4616_v6  ;;  %3290 = vmatprep.subr.bf16.mxu1 %v4619_v7  ;;  %v4692_v6 = vld [vmem:[%s6308_s1 + $0xb08] ss:$36 sps:$4 sm:$0xff]   ;;  %v4695_v7 = vld [vmem:[%s6308_s1 + $0xb10] ss:$36 sps:$4 sm:$0xff]  }
 0x12b   :  { %3138 = vmatpush1.bf16.msra.mxu0 %v4614_v8  ;;  %3291 = vmatpush1.bf16.msra.mxu1 %v4617_v9  ;;  %v4700_v8 = vld [vmem:[%s6308_s1 + $0xb54] ss:$36 sps:$4 sm:$0xff]   ;;  %v4703_v9 = vld [vmem:[%s6308_s1 + $0xb5c] ss:$36 sps:$4 sm:$0xff]  }
 0x12c   :  { %3139 = vmatprep.subr.bf16.mxu0 %v4622_v10  ;;  %3292 = vmatprep.subr.bf16.mxu1 %v4625_v11  ;;  %v4698_v10 = vld [vmem:[%s6308_s1 + $0xb50] ss:$36 sps:$4 sm:$0xff]   ;;  %v4701_v11 = vld [vmem:[%s6308_s1 + $0xb58] ss:$36 sps:$4 sm:$0xff]  }
 0x12f   :  { %3140 = vmatpush1.bf16.msra.mxu0 %v4620_v12  ;;  %3293 = vmatpush1.bf16.msra.mxu1 %v4623_v13  ;;  %v4706_v12 = vld [vmem:[%s6308_s1 + $0xb9c] ss:$36 sps:$4 sm:$0xff]   ;;  %v4709_v13 = vld [vmem:[%s6308_s1 + $0xba4] ss:$36 sps:$4 sm:$0xff]  }
 0x130   :  { %3141 = vmatprep.subr.bf16.mxu0 %v4628_v15  ;;  %3294 = vmatprep.subr.bf16.mxu1 %v4631_v16  ;;  %v4704_v15 = vld [vmem:[%s6308_s1 + $0xb98] ss:$36 sps:$4 sm:$0xff]   ;;  %v4707_v16 = vld [vmem:[%s6308_s1 + $0xba0] ss:$36 sps:$4 sm:$0xff]  }
 0x133   :  { %3142 = vmatpush1.bf16.msra.mxu0 %v4626_v17  ;;  %3295 = vmatpush1.bf16.msra.mxu1 %v4629_v18  ;;  %v4712_v17 = vld [vmem:[%s6308_s1 + $0xbe4] ss:$36 sps:$4 sm:$0xff]   ;;  %v4715_v18 = vld [vmem:[%s6308_s1 + $0xbec] ss:$36 sps:$4 sm:$0xff]  }
 0x134   :  { %3143 = vmatprep.subr.bf16.mxu0 %v4634_v20  ;;  %3296 = vmatprep.subr.bf16.mxu1 %v4637_v21  ;;  %v4710_v20 = vld [vmem:[%s6308_s1 + $0xbe0] ss:$36 sps:$4 sm:$0xff]   ;;  %v4713_v21 = vld [vmem:[%s6308_s1 + $0xbe8] ss:$36 sps:$4 sm:$0xff]  }
 0x137   :  { %3144 = vmatpush1.bf16.msra.mxu0 %v4632_v22  ;;  %3297 = vmatpush1.bf16.msra.mxu1 %v4635_v24  ;;  %v4718_v22 = vld [vmem:[%s6308_s1 + $0xc2c] ss:$36 sps:$4 sm:$0xff]   ;;  %v4721_v24 = vld [vmem:[%s6308_s1 + $0xc34] ss:$36 sps:$4 sm:$0xff]  }
 0x138   :  { %3145 = vmatprep.subr.bf16.mxu0 %v4640_v26  ;;  %3298 = vmatprep.subr.bf16.mxu1 %v4643_v28  ;;  %v4716_v26 = vld [vmem:[%s6308_s1 + $0xc28] ss:$36 sps:$4 sm:$0xff]   ;;  %v4719_v28 = vld [vmem:[%s6308_s1 + $0xc30] ss:$36 sps:$4 sm:$0xff]  }
 0x13b   :  { %3146 = vmatpush1.bf16.msra.mxu0 %v4638_v29  ;;  %3299 = vmatpush1.bf16.msra.mxu1 %v4641_v31  ;;  %v4724_v29 = vld [vmem:[%s6308_s1 + $0xc74] ss:$36 sps:$4 sm:$0xff]   ;;  %v4727_v31 = vld [vmem:[%s6308_s1 + $0xc7c] ss:$36 sps:$4 sm:$0xff]  }
 0x13c   :  { %3147 = vmatprep.subr.bf16.mxu0 %v4646_v32  ;;  %3300 = vmatprep.subr.bf16.mxu1 %v4649_v33  ;;  %v4722_v32 = vld [vmem:[%s6308_s1 + $0xc70] ss:$36 sps:$4 sm:$0xff]   ;;  %v4725_v33 = vld [vmem:[%s6308_s1 + $0xc78] ss:$36 sps:$4 sm:$0xff]  }
 0x13f   :  { %3148 = vmatpush1.bf16.msra.mxu0 %v4644_v35  ;;  %3301 = vmatpush1.bf16.msra.mxu1 %v4647_v36  ;;  %v4730_v35 = vld [vmem:[%s6308_s1 + $0xcbc] ss:$36 sps:$4 sm:$0xff]   ;;  %v4733_v36 = vld [vmem:[%s6308_s1 + $0xcc4] ss:$36 sps:$4 sm:$0xff]  }
 0x140   :  { %3168 = vmatprep.subr.bf16.mxu0 %v4652_v37  ;;  %3321 = vmatprep.subr.bf16.mxu1 %v4655_v38  ;;  %v4728_v37 = vld [vmem:[%s6308_s1 + $0xcb8] ss:$36 sps:$4 sm:$0xff]   ;;  %v4731_v38 = vld [vmem:[%s6308_s1 + $0xcc0] ss:$36 sps:$4 sm:$0xff]  }
 0x142   :  { %3150 = vmatmul.mubr.bf16.vlgmr.msra.gmra.mrb[8].mxu0 %v5869_v43  ;;  %3303 = vmatmul.mubr.bf16.vlgmr.msra.gmra.mrb[8].mxu1 %v5869_v43 }
 0x143   :  { %3169 = vmatpush1.bf16.msra.mxu0 %v4650_v39  ;;  %3322 = vmatpush1.bf16.msra.mxu1 %v4653_v40  ;;  %v4736_v39 = vld [vmem:[%s6308_s1 + $0xd04] ss:$36 sps:$4 sm:$0xff]   ;;  %v4739_v40 = vld [vmem:[%s6308_s1 + $0xd0c] ss:$36 sps:$4 sm:$0xff]  }
 0x144   :  { %3170 = vmatprep.subr.bf16.mxu0 %v4658_v41  ;;  %3323 = vmatprep.subr.bf16.mxu1 %v4661_v42  ;;  %v4734_v41 = vld [vmem:[%s6308_s1 + $0xd00] ss:$36 sps:$4 sm:$0xff]   ;;  %v4737_v42 = vld [vmem:[%s6308_s1 + $0xd08] ss:$36 sps:$4 sm:$0xff]  }
 0x145   :  { %3159 = vmatprep.mubr.bf16.mxu0 %v5244_v14  ;;  %3312 = vmatprep.mubr.bf16.mxu1 %v5244_v14 }
 0x147   :  { %3171 = vmatpush1.bf16.msra.mxu0 %v4656_v44  ;;  %3324 = vmatpush1.bf16.msra.mxu1 %v4659_v45  ;;  %v4742_v44 = vld [vmem:[%s6308_s1 + $0xd4c] ss:$36 sps:$4 sm:$0xff]   ;;  %v4745_v45 = vld [vmem:[%s6308_s1 + $0xd54] ss:$36 sps:$4 sm:$0xff]  }
 0x148   :  { %3172 = vmatprep.subr.bf16.mxu0 %v4664_v46  ;;  %3325 = vmatprep.subr.bf16.mxu1 %v4667_v47  ;;  %v4740_v46 = vld [vmem:[%s6308_s1 + $0xd48] ss:$36 sps:$4 sm:$0xff]   ;;  %v4743_v47 = vld [vmem:[%s6308_s1 + $0xd50] ss:$36 sps:$4 sm:$0xff]  }
 0x14a   :  { %3160 = vmatmul.mubr.bf16.gmra.mrb[12].mxu0 %v5260_v19  ;;  %3313 = vmatmul.mubr.bf16.gmra.mrb[12].mxu1 %v5260_v19 }
 0x14b   :  { %3173 = vmatpush1.bf16.msra.mxu0 %v4662_v49  ;;  %3326 = vmatpush1.bf16.msra.mxu1 %v4665_v50  ;;  %v4746_v49 = vld [vmem:[%s6308_s1 + $0x260] ss:$36 sps:$4 sm:$0xff]  }
 0x14c   :  { %3174 = vmatprep.subr.bf16.mxu0 %v4670_v51  ;;  %3327 = vmatprep.subr.bf16.mxu1 %v4673_v52  ;;  %v4747_v50 = vld [vmem:[%s6308_s1 + $0x6e0] ss:$36 sps:$4 sm:$0xff]  }
 0x14d   :  { %3200 = vmatprep.mubr.bf16.mxu0 %v5916_v57  ;;  %3353 = vmatprep.mubr.bf16.mxu1 %v5916_v57  ;;  %v4748_v51 = vld [vmem:[%s6308_s1 + $0x20] ss:$36 sps:$4 sm:$0xff]  }
 0x14e   :  { %v4749_v52 = vld [vmem:[%s6308_s1 + $0x4a0] ss:$36 sps:$4 sm:$0xff]  }
 0x14f   :  { %3175 = vmatpush1.bf16.msra.mxu0 %v4668_v53  ;;  %3328 = vmatpush1.bf16.msra.mxu1 %v4671_v54  ;;  %v4750_v53 = vld [vmem:[%s6308_s1 + $0x2a8] ss:$36 sps:$4 sm:$0xff]  }
 0x150   :  { %3176 = vmatprep.subr.bf16.mxu0 %v4676_v55  ;;  %3329 = vmatprep.subr.bf16.mxu1 %v4679_v56  ;;  %v4751_v54 = vld [vmem:[%s6308_s1 + $0x728] ss:$36 sps:$4 sm:$0xff]  }
 0x151   :  { %v6079_v55 = vld [vmem:[%s6309_s0 + $0x10] ss:$24 sps:$4 sm:$0xff]  }
 0x152   :  { %v4752_v56 = vld [vmem:[%s6308_s1 + $0x68] ss:$36 sps:$4 sm:$0xff]  }
 0x153   :  { %3177 = vmatpush1.bf16.msra.mxu0 %v4674_v58  ;;  %3330 = vmatpush1.bf16.msra.mxu1 %v4677_v59  ;;  %v4753_v58 = vld [vmem:[%s6308_s1 + $0x4e8] ss:$36 sps:$4 sm:$0xff]   ;;  %v4754_v59 = vld [vmem:[%s6308_s1 + $0x2f0] ss:$36 sps:$4 sm:$0xff]  }
 0x154   :  { %3178 = vmatprep.subr.bf16.mxu0 %v4682_v60  ;;  %3331 = vmatprep.subr.bf16.mxu1 %v4685_v61  ;;  %v4755_v60 = vld [vmem:[%s6308_s1 + $0x770] ss:$36 sps:$4 sm:$0xff]  }
 0x155   :  { %v4756_v61 = vld [vmem:[%s6308_s1 + $0xb0] ss:$36 sps:$4 sm:$0xff]  }
 0x157   :  { %3179 = vmatpush1.bf16.msra.mxu0 %v4680_v62  ;;  %3332 = vmatpush1.bf16.msra.mxu1 %v4683_v63  ;;  %v4757_v62 = vld [vmem:[%s6308_s1 + $0x530] ss:$36 sps:$4 sm:$0xff]   ;;  %v4758_v63 = vld [vmem:[%s6308_s1 + $0x338] ss:$36 sps:$4 sm:$0xff]  }
 0x158   :  { %3180 = vmatprep.subr.bf16.mxu0 %v4688_v0  ;;  %3333 = vmatprep.subr.bf16.mxu1 %v4691_v1  ;;  %v4759_v0 = vld [vmem:[%s6308_s1 + $0x7b8] ss:$36 sps:$4 sm:$0xff]  }
 0x159   :  { %v4760_v1 = vld [vmem:[%s6308_s1 + $0xf8] ss:$36 sps:$4 sm:$0xff]  }
 0x15b   :  { %3181 = vmatpush1.bf16.msra.mxu0 %v4686_v2  ;;  %3334 = vmatpush1.bf16.msra.mxu1 %v4689_v3  ;;  %v4761_v2 = vld [vmem:[%s6308_s1 + $0x578] ss:$36 sps:$4 sm:$0xff]   ;;  %v4762_v3 = vld [vmem:[%s6308_s1 + $0x380] ss:$36 sps:$4 sm:$0xff]  }
 0x15c   :  { %3182 = vmatprep.subr.bf16.mxu0 %v4694_v4  ;;  %3335 = vmatprep.subr.bf16.mxu1 %v4697_v5  ;;  %v4763_v4 = vld [vmem:[%s6308_s1 + $0x800] ss:$36 sps:$4 sm:$0xff]  }
 0x15d   :  { %v4800_v5 = vld [vmem:[%s6309_s0 + $0x4] ss:$24 sps:$4 sm:$0xff]  }
 0x15f   :  { %3183 = vmatpush1.bf16.msra.mxu0 %v4692_v6  ;;  %3336 = vmatpush1.bf16.msra.mxu1 %v4695_v7  ;;  %v4764_v6 = vld [vmem:[%s6308_s1 + $0x140] ss:$36 sps:$4 sm:$0xff]  }
 0x160   :  { %3184 = vmatprep.subr.bf16.mxu0 %v4700_v8  ;;  %3337 = vmatprep.subr.bf16.mxu1 %v4703_v9  ;;  %v4765_v7 = vld [vmem:[%s6308_s1 + $0x5c0] ss:$36 sps:$4 sm:$0xff]   ;;  %v4766_v8 = vld [vmem:[%s6308_s1 + $0x3c8] ss:$36 sps:$4 sm:$0xff]  }
 0x161   :  { %v4768_v9 = vld [vmem:[%s6308_s1 + $0x188] ss:$36 sps:$4 sm:$0xff]  }
 0x163   :  { %3185 = vmatpush1.bf16.msra.mxu0 %v4698_v10  ;;  %3338 = vmatpush1.bf16.msra.mxu1 %v4701_v11  ;;  %v4769_v10 = vld [vmem:[%s6308_s1 + $0x608] ss:$36 sps:$4 sm:$0xff]   ;;  %v4770_v11 = vld [vmem:[%s6308_s1 + $0x410] ss:$36 sps:$4 sm:$0xff]  }
 0x164   :  { %3186 = vmatprep.subr.bf16.mxu0 %v4706_v12  ;;  %3339 = vmatprep.subr.bf16.mxu1 %v4709_v13  ;;  %v4771_v12 = vld [vmem:[%s6308_s1 + $0x890] ss:$36 sps:$4 sm:$0xff]  }
 0x167   :  { %3187 = vmatpush1.bf16.msra.mxu0 %v4704_v15  ;;  %3340 = vmatpush1.bf16.msra.mxu1 %v4707_v16 }
 0x168   :  { %3188 = vmatprep.subr.bf16.mxu0 %v4712_v17  ;;  %3341 = vmatprep.subr.bf16.mxu1 %v4715_v18 }
 0x16b   :  { %3189 = vmatpush1.bf16.msra.mxu0 %v4710_v20  ;;  %3342 = vmatpush1.bf16.msra.mxu1 %v4713_v21  ;;  %v4772_v21 = vld [vmem:[%s6308_s1 + $0x1d0] ss:$36 sps:$4 sm:$0xff]  }
 0x16c   :  { %3190 = vmatprep.subr.bf16.mxu0 %v4718_v22  ;;  %3343 = vmatprep.subr.bf16.mxu1 %v4721_v24  ;;  %v4773_v22 = vld [vmem:[%s6308_s1 + $0x650] ss:$36 sps:$4 sm:$0xff]  }
 0x16f   :  { %3191 = vmatpush1.bf16.msra.mxu0 %v4716_v26  ;;  %3344 = vmatpush1.bf16.msra.mxu1 %v4719_v28  ;;  %v4774_v28 = vld [vmem:[%s6308_s1 + $0x458] ss:$36 sps:$4 sm:$0xff]  }
 0x170   :  { %3192 = vmatprep.subr.bf16.mxu0 %v4724_v29  ;;  %3345 = vmatprep.subr.bf16.mxu1 %v4727_v31  ;;  %v4775_v29 = vld [vmem:[%s6308_s1 + $0x8d8] ss:$36 sps:$4 sm:$0xff]  }
 0x171   :  { %v4776_v31 = vld [vmem:[%s6308_s1 + $0x218] ss:$36 sps:$4 sm:$0xff]  }
 0x173   :  { %3193 = vmatpush1.bf16.msra.mxu0 %v4722_v32  ;;  %3346 = vmatpush1.bf16.msra.mxu1 %v4725_v33  ;;  %v4777_v32 = vld [vmem:[%s6308_s1 + $0x698] ss:$36 sps:$4 sm:$0xff]   ;;  %v4778_v33 = vld [vmem:[%s6308_s1 + $0xb60] ss:$36 sps:$4 sm:$0xff]  }
 0x174   :  { %3194 = vmatprep.subr.bf16.mxu0 %v4730_v35  ;;  %3347 = vmatprep.subr.bf16.mxu1 %v4733_v36 }
 0x177   :  { %3195 = vmatpush1.bf16.msra.mxu0 %v4728_v37  ;;  %3348 = vmatpush1.bf16.msra.mxu1 %v4731_v38 }
 0x178   :  { %3196 = vmatprep.subr.bf16.mxu0 %v4736_v39  ;;  %3349 = vmatprep.subr.bf16.mxu1 %v4739_v40 }
 0x17b   :  { %3197 = vmatpush1.bf16.msra.mxu0 %v4734_v41  ;;  %3350 = vmatpush1.bf16.msra.mxu1 %v4737_v42  ;;  %v4779_v41 = vld [vmem:[%s6308_s1 + $0x920] ss:$36 sps:$4 sm:$0xff]  }
 0x17c   :  { %3198 = vmatprep.subr.bf16.mxu0 %v4742_v44  ;;  %3351 = vmatprep.subr.bf16.mxu1 %v4745_v45  ;;  %v4780_v45 = vld [vmem:[%s6308_s1 + $0xba8] ss:$36 sps:$4 sm:$0xff]  }
 0x17f   :  { %3199 = vmatpush1.bf16.msra.mxu0 %v4740_v46  ;;  %3352 = vmatpush1.bf16.msra.mxu1 %v4743_v47  ;;  %v4781_v46 = vld [vmem:[%s6308_s1 + $0x968] ss:$36 sps:$4 sm:$0xff]   ;;  %v4782_v47 = vld [vmem:[%s6308_s1 + $0xbf0] ss:$36 sps:$4 sm:$0xff]  }
 0x180   :  { %3991 = vmatprep.subr.bf16.mxu0 %v4746_v49  ;;  %4019 = vmatprep.subr.bf16.mxu1 %v4747_v50  ;;  %v4791_v49 = vld [vmem:[%s6308_s1 + $0xad0] ss:$36 sps:$4 sm:$0xff]   ;;  %v4792_v50 = vld [vmem:[%s6308_s1 + $0xd58] ss:$36 sps:$4 sm:$0xff]  }
 0x182   :  { %3201 = vmatmul.mubr.bf16.vlgmr.msra.gmra.mrb[8].mxu0 %v6079_v55  ;;  %3354 = vmatmul.mubr.bf16.vlgmr.msra.gmra.mrb[8].mxu1 %v6079_v55 }
 0x183   :  { %3992 = vmatpush3.bf16.msra.mxu0 %v4748_v51  ;;  %4020 = vmatpush3.bf16.msra.mxu1 %v4749_v52  ;;  %v4793_v51 = vld [vmem:[%s6308_s1 + $0xb18] ss:$36 sps:$4 sm:$0xff]  }
 0x184   :  { %3993 = vmatprep.subr.bf16.mxu0 %v4750_v53  ;;  %4021 = vmatprep.subr.bf16.mxu1 %v4751_v54 }
 0x185   :  { %3210 = vmatprep.mubr.bf16.mxu0 %v5453_v23  ;;  %3363 = vmatprep.mubr.bf16.mxu1 %v5453_v23 }
 0x187   :  { %3994 = vmatpush3.bf16.msra.mxu0 %v4752_v56  ;;  %4022 = vmatpush3.bf16.msra.mxu1 %v4753_v58 }
 0x188   :  { %3995 = vmatprep.subr.bf16.mxu0 %v4754_v59  ;;  %4023 = vmatprep.subr.bf16.mxu1 %v4755_v60 }
 0x18a   :  { %3211 = vmatmul.mubr.bf16.gmra.mrb[12].mxu0 %v5469_v30  ;;  %3364 = vmatmul.mubr.bf16.gmra.mrb[12].mxu1 %v5469_v30 }
 0x18b   :  { %3996 = vmatpush3.bf16.msra.mxu0 %v4756_v61  ;;  %4024 = vmatpush3.bf16.msra.mxu1 %v4757_v62 }
 0x18c   :  { %3997 = vmatprep.subr.bf16.mxu0 %v4758_v63  ;;  %4025 = vmatprep.subr.bf16.mxu1 %v4759_v0 }
 0x18d   :  { %3404 = vmatprep.mubr.bf16.mxu0 %v4800_v5  ;;  %3452 = vmatprep.mubr.bf16.mxu1 %v5709_v48  ;;  %v4767_v48 = vld [vmem:[%s6308_s1 + $0x848] ss:$36 sps:$4 sm:$0xff]  }
 0x18f   :  { %3998 = vmatpush3.bf16.msra.mxu0 %v4760_v1  ;;  %4026 = vmatpush3.bf16.msra.mxu1 %v4761_v2 }
 0x190   :  { %3999 = vmatprep.subr.bf16.mxu0 %v4762_v3  ;;  %4027 = vmatprep.subr.bf16.mxu1 %v4763_v4 }
 0x193   :  { %4000 = vmatpush3.bf16.msra.mxu0 %v4764_v6  ;;  %4028 = vmatpush3.bf16.msra.mxu1 %v4765_v7 }
 0x194   :  { %4001 = vmatprep.subr.bf16.mxu0 %v4766_v8  ;;  %4029 = vmatprep.subr.bf16.mxu1 %v4767_v48 }
 0x195   :  { %v2896_v13 = vpop.f32.mrb[0].mxu0  ;;  %v3049_v15 = vpop.f32.mrb[0].mxu1 }
 0x196   :  { %3516 = vst [vmem:[%s6310_s2] sm:$0xff] %v2896_v13  ;;  %3518 = vst [vmem:[%s6310_s2 + $0x10] sm:$0xff] %v3049_v15  ;;  %v2898_v16 = vpop.f32.mrb[1].mxu0  ;;  %v3051_v17 = vpop.f32.mrb[1].mxu1 }
 0x197   :  { %3517 = vst [vmem:[%s6310_s2 + $0x8] sm:$0xff] %v2898_v16  ;;  %3519 = vst [vmem:[%s6310_s2 + $0x18] sm:$0xff] %v3051_v17  ;;  %v2900_v18 = vpop.f32.mrb[2].mxu0  ;;  %v3053_v20 = vpop.f32.mrb[2].mxu1  ;;  %4002 = vmatpush3.bf16.msra.mxu0 %v4768_v9  ;;  %4030 = vmatpush3.bf16.msra.mxu1 %v4769_v10 }
 0x198   :  { %3525 = vst [vmem:[%s6310_s2 + $0x48] sm:$0xff] %v2900_v18  ;;  %3527 = vst [vmem:[%s6310_s2 + $0x58] sm:$0xff] %v3053_v20  ;;  %v2902_v24 = vpop.f32.mrb[3].mxu0  ;;  %v3055_v26 = vpop.f32.mrb[3].mxu1  ;;  %4003 = vmatprep.subr.bf16.mxu0 %v4770_v11  ;;  %4031 = vmatprep.subr.bf16.mxu1 %v4771_v12 }
 0x199   :  { %3526 = vst [vmem:[%s6310_s2 + $0x50] sm:$0xff] %v2902_v24  ;;  %3528 = vst [vmem:[%s6310_s2 + $0x60] sm:$0xff] %v3055_v26 }
 0x19b   :  { %4004 = vmatpush3.bf16.msra.mxu0 %v4772_v21  ;;  %4032 = vmatpush3.bf16.msra.mxu1 %v4773_v22 }
 0x19c   :  { %4005 = vmatprep.subr.bf16.mxu0 %v4774_v28  ;;  %4033 = vmatprep.subr.bf16.mxu1 %v4775_v29 }
 0x19d   :  { %v2906_v35 = vpop.f32.mrb[4].mxu0  ;;  %v3059_v36 = vpop.f32.mrb[4].mxu1 }
 0x19e   :  { %3534 = vst [vmem:[%s6310_s2 + $0x90] sm:$0xff] %v2906_v35  ;;  %3536 = vst [vmem:[%s6310_s2 + $0xa0] sm:$0xff] %v3059_v36  ;;  %v2908_v37 = vpop.f32.mrb[5].mxu0  ;;  %v3061_v38 = vpop.f32.mrb[5].mxu1 }
 0x19f   :  { %3535 = vst [vmem:[%s6310_s2 + $0x98] sm:$0xff] %v2908_v37  ;;  %3537 = vst [vmem:[%s6310_s2 + $0xa8] sm:$0xff] %v3061_v38  ;;  %v2910_v39 = vpop.f32.mrb[6].mxu0  ;;  %v3063_v40 = vpop.f32.mrb[6].mxu1  ;;  %4006 = vmatpush3.bf16.msra.mxu0 %v4776_v31  ;;  %4034 = vmatpush3.bf16.msra.mxu1 %v4777_v32 }
 0x1a0   :  { %v2911_v42 = vpop.f32.mrb[7].mxu0  ;;  %v3064_v44 = vpop.f32.mrb[7].mxu1  ;;  %4047 = vmatprep.subr.bf16.mxu0 %v4778_v33  ;;  %4075 = vmatprep.subr.bf16.mxu1 %v4778_v33 }
 0x1a2   :  { %3405 = vmatmul.mubr.bf16.vlgmr.msra.gmra.mrb[16].mxu0 %v5659_v34  ;;  %3453 = vmatmul.mubr.bf16.vlgmr.msra.gmra.mrb[16].mxu1 %v5869_v43  ;;  %v4783_v34 = vld [vmem:[%s6308_s1 + $0x9b0] ss:$36 sps:$4 sm:$0xff]   ;;  %v4784_v43 = vld [vmem:[%s6308_s1 + $0xc38] ss:$36 sps:$4 sm:$0xff]  }
 0x1a3   :  { %4048 = vmatpush3.bf16.msra.mxu0 %v4779_v41  ;;  %4083 = vmatpush3.bf16.msra.mxu1 %v4779_v41 }
 0x1a4   :  { %4049 = vmatprep.subr.bf16.mxu0 %v4780_v45  ;;  %4076 = vmatprep.subr.bf16.mxu1 %v4780_v45 }
 0x1a5   :  { %3412 = vmatprep.mubr.bf16.mxu0 %v5083_v25  ;;  %3460 = vmatprep.mubr.bf16.mxu1 %v5244_v14  ;;  %v4785_v25 = vld [vmem:[%s6308_s1 + $0x9f8] ss:$36 sps:$4 sm:$0xff]   ;;  %v4786_v14 = vld [vmem:[%s6308_s1 + $0xc80] ss:$36 sps:$4 sm:$0xff]  }
 0x1a7   :  { %4050 = vmatpush3.bf16.msra.mxu0 %v4781_v46  ;;  %4084 = vmatpush3.bf16.msra.mxu1 %v4781_v46 }
 0x1a8   :  { %4051 = vmatprep.subr.bf16.mxu0 %v4782_v47  ;;  %4077 = vmatprep.subr.bf16.mxu1 %v4782_v47 }
 0x1aa   :  { %3413 = vmatmul.mubr.bf16.gmra.mrb[20].mxu0 %v5088_v27  ;;  %3461 = vmatmul.mubr.bf16.gmra.mrb[20].mxu1 %v5260_v19  ;;  %v4787_v27 = vld [vmem:[%s6308_s1 + $0xa40] ss:$36 sps:$4 sm:$0xff]   ;;  %v4788_v19 = vld [vmem:[%s6308_s1 + $0xcc8] ss:$36 sps:$4 sm:$0xff]  }
 0x1ab   :  { %4052 = vmatpush3.bf16.msra.mxu0 %v4783_v34  ;;  %4085 = vmatpush3.bf16.msra.mxu1 %v4783_v34 }
 0x1ac   :  { %4053 = vmatprep.subr.bf16.mxu0 %v4784_v43  ;;  %4078 = vmatprep.subr.bf16.mxu1 %v4784_v43 }
 0x1ad   :  { %3500 = vmatprep.mubr.bf16.mxu0 %v5916_v57  ;;  %3508 = vmatprep.mubr.bf16.mxu1 %v5453_v23  ;;  %v4789_v57 = vld [vmem:[%s6308_s1 + $0xa88] ss:$36 sps:$4 sm:$0xff]   ;;  %v4790_v23 = vld [vmem:[%s6308_s1 + $0xd10] ss:$36 sps:$4 sm:$0xff]  }
 0x1af   :  { %4054 = vmatpush3.bf16.msra.mxu0 %v4785_v25  ;;  %4086 = vmatpush3.bf16.msra.mxu1 %v4785_v25 }
 0x1b0   :  { %4055 = vmatprep.subr.bf16.mxu0 %v4786_v14  ;;  %4079 = vmatprep.subr.bf16.mxu1 %v4786_v14 }
 0x1b3   :  { %4056 = vmatpush3.bf16.msra.mxu0 %v4787_v27  ;;  %4087 = vmatpush3.bf16.msra.mxu1 %v4787_v27 }
 0x1b4   :  { %4057 = vmatprep.subr.bf16.mxu0 %v4788_v19  ;;  %4080 = vmatprep.subr.bf16.mxu1 %v4788_v19 }
 0x1b7   :  { %4058 = vmatpush3.bf16.msra.mxu0 %v4789_v57  ;;  %4088 = vmatpush3.bf16.msra.mxu1 %v4789_v57 }
 0x1b8   :  { %4059 = vmatprep.subr.bf16.mxu0 %v4790_v23  ;;  %4081 = vmatprep.subr.bf16.mxu1 %v4790_v23 }
 0x1bb   :  { %4060 = vmatpush3.bf16.msra.mxu0 %v4791_v49  ;;  %4089 = vmatpush3.bf16.msra.mxu1 %v4791_v49 }
 0x1bc   :  { %4061 = vmatprep.subr.bf16.mxu0 %v4792_v50  ;;  %4082 = vmatprep.subr.bf16.mxu1 %v4792_v50 }
 0x1bf   :  { %4062 = vmatpush3.bf16.msra.mxu0 %v4793_v51  ;;  %4090 = vmatpush3.bf16.msra.mxu1 %v4793_v51 }
 0x1c2   :  { %3501 = vmatmul.mubr.bf16.vlgmr.msra.gmra.mrb[24].mxu0 %v6079_v55  ;;  %3509 = vmatmul.mubr.bf16.vlgmr.msra.gmra.mrb[24].mxu1 %v5469_v30 }
 0x255   :  { %v3202_v52 = vpop.f32.mrb[8].mxu0  ;;  %v3355_v53 = vpop.f32.mrb[8].mxu1 }
 0x256   :  { %3520 = vst [vmem:[%s6310_s2 + $0x20] sm:$0xff] %v3202_v52  ;;  %3522 = vst [vmem:[%s6310_s2 + $0x30] sm:$0xff] %v3355_v53  ;;  %v3204_v54 = vpop.f32.mrb[9].mxu0  ;;  %v3357_v56 = vpop.f32.mrb[9].mxu1 }
 0x257   :  { %3521 = vst [vmem:[%s6310_s2 + $0x28] sm:$0xff] %v3204_v54  ;;  %3523 = vst [vmem:[%s6310_s2 + $0x38] sm:$0xff] %v3357_v56  ;;  %v3206_v30 = vpop.f32.mrb[10].mxu0  ;;  %v3359_v55 = vpop.f32.mrb[10].mxu1 }
 0x258   :  { %3529 = vst [vmem:[%s6310_s2 + $0x68] sm:$0xff] %v3206_v30  ;;  %3531 = vst [vmem:[%s6310_s2 + $0x78] sm:$0xff] %v3359_v55  ;;  %v3208_v58 = vpop.f32.mrb[11].mxu0  ;;  %v3361_v59 = vpop.f32.mrb[11].mxu1 }
 0x259   :  { %3530 = vst [vmem:[%s6310_s2 + $0x70] sm:$0xff] %v3208_v58  ;;  %3532 = vst [vmem:[%s6310_s2 + $0x80] sm:$0xff] %v3361_v59 }
 0x25d   :  { %v3212_v60 = vpop.f32.mrb[12].mxu0  ;;  %v3365_v61 = vpop.f32.mrb[12].mxu1 }
 0x25e   :  { %3538 = vst [vmem:[%s6310_s2 + $0xb0] sm:$0xff] %v3212_v60  ;;  %3540 = vst [vmem:[%s6310_s2 + $0xc0] sm:$0xff] %v3365_v61  ;;  %v3214_v62 = vpop.f32.mrb[13].mxu0  ;;  %v3367_v63 = vpop.f32.mrb[13].mxu1 }
 0x25f   :  { %3539 = vst [vmem:[%s6310_s2 + $0xb8] sm:$0xff] %v3214_v62  ;;  %3541 = vst [vmem:[%s6310_s2 + $0xc8] sm:$0xff] %v3367_v63  ;;  %v3216_v0 = vpop.f32.mrb[14].mxu0  ;;  %v3369_v1 = vpop.f32.mrb[14].mxu1 }
 0x260   :  { %v3217_v2 = vpop.f32.mrb[15].mxu0  ;;  %v3370_v3 = vpop.f32.mrb[15].mxu1 }
 0x275   :  { %v4007_v4 = vpop.f32.mrb[16].mxu0  ;;  %v4035_v5 = vpop.f32.mrb[16].mxu1 }
 0x276   :  { %v4008_v6 = vpop.f32.mrb[17].mxu0  ;;  %v4036_v7 = vpop.f32.mrb[17].mxu1 }
 0x277   :  { %v4009_v8 = vadd.f32 %v4008_v6, %v4007_v4  ;;  %v4037_v48 = vadd.f32 %v4036_v7, %v4035_v5  ;;  %v4010_v9 = vpop.f32.mrb[18].mxu0  ;;  %v4038_v10 = vpop.f32.mrb[18].mxu1 }
 0x278   :  { %v4011_v11 = vpop.f32.mrb[19].mxu0  ;;  %v4039_v12 = vpop.f32.mrb[19].mxu1 }
 0x279   :  { %v3455_v13 = vadd.f32 %v4037_v48, %v4009_v8  ;;  %v4012_v15 = vadd.f32 %v4011_v11, %v4010_v9  ;;  %v4040_v16 = vadd.f32 %v4039_v12, %v4038_v10 }
 0x27b   :  { %v3458_v17 = vadd.f32 %v4040_v16, %v4012_v15 }
 0x27d   :  { %v4013_v18 = vpop.f32.mrb[20].mxu0  ;;  %v4041_v20 = vpop.f32.mrb[20].mxu1 }
 0x27e   :  { %v4014_v21 = vpop.f32.mrb[21].mxu0  ;;  %v4042_v22 = vpop.f32.mrb[21].mxu1 }
 0x27f   :  { %v4015_v24 = vadd.f32 %v4014_v21, %v4013_v18  ;;  %v4016_v26 = vpop.f32.mrb[22].mxu0  ;;  %v4043_v28 = vadd.f32 %v4042_v22, %v4041_v20  ;;  %v4044_v29 = vpop.f32.mrb[22].mxu1 }
 0x280   :  { %v4017_v31 = vpop.f32.mrb[23].mxu0  ;;  %v4045_v32 = vpop.f32.mrb[23].mxu1 }
 0x281   :  { %v3463_v33 = vadd.f32 %v4043_v28, %v4015_v24 }
 0x295   :  { %v4063_v35 = vpop.f32.mrb[24].mxu0  ;;  %v4069_v36 = vpop.f32.mrb[24].mxu1 }
 0x296   :  { %v4064_v37 = vpop.f32.mrb[25].mxu0  ;;  %v4070_v38 = vpop.f32.mrb[25].mxu1 }
 0x297   :  { %v4065_v39 = vadd.f32 %v4064_v37, %v4063_v35  ;;  %v4071_v40 = vadd.f32 %v4070_v38, %v4069_v36  ;;  %v4066_v41 = vpop.f32.mrb[26].mxu0  ;;  %v4072_v42 = vpop.f32.mrb[26].mxu1 }
 0x298   :  { %v4067_v44 = vpop.f32.mrb[27].mxu0  ;;  %v4073_v45 = vpop.f32.mrb[27].mxu1 }
 0x299   :  { %v3503_v46 = vadd.f32 %v4065_v39, %v3455_v13  ;;  %v3511_v47 = vadd.f32 %v4071_v40, %v3463_v33  ;;  %v4068_v34 = vadd.f32 %v4067_v44, %v4066_v41 }
 0x29b   :  { %3524 = vst [vmem:[%s6310_s2 + $0x40] sm:$0xff] %v3503_v46  ;;  %3542 = vst [vmem:[%s6310_s2 + $0xd0] sm:$0xff] %v3511_v47  ;;  %v3506_v43 = vadd.f32 %v4068_v34, %v3458_v17 }
 0x29d   :  { %3533 = vst [vmem:[%s6310_s2 + $0x88] sm:$0xff] %v3506_v43 }

// kernel: dnn_forward.5
= control target key start
LH: loop header
LB: loop body
LE: loop exit
PB: predicated region body
PF: predicated region fallthrough
CT: control target
= control target key end

     0   :  { %vm846_vm0 = vcmask 261120   ;;  %vm850_vm1 = vcmask 257024   ;;  %s1471_s1 = inlined_call_operand.vmem [shape: bf16[512,288], index: 1, kind: input, shape index: {}]   ;;  %s1472_s0 = inlined_call_operand.vmem [shape: bf16[12,512], index: 0, kind: input, shape index: {}]   ;;  %s1473_s2 = inlined_call_operand.vmem [shape: f32[12,288], index: 2, kind: output, shape index: {}]  }
   0x1   :  { %v1004_v0 = vld [vmem:[%s1471_s1 + $0x4] ss:$12 sps:$4 sm:$0xff]   ;;  %v1006_v1 = vld [vmem:[%s1471_s1] ss:$12 sps:$4 sm:$0xff]   ;;  %v1007_v2 = vld [vmem:[%s1471_s1 + $0x1c] ss:$12 sps:$4 sm:$0xff]  }
   0x2   :  { %676 = vmatprep.subr.bf16.mxu0 %v1004_v0  ;;  %v1009_v3 = vld [vmem:[%s1471_s1 + $0x18] ss:$12 sps:$4 sm:$0xff]   ;;  %v1010_v4 = vld [vmem:[%s1471_s1 + $0x34] ss:$12 sps:$4 sm:$0xff]   ;;  %v1012_v5 = vld [vmem:[%s1471_s1 + $0x30] ss:$12 sps:$4 sm:$0xff]  }
   0x3   :  { %677 = vmatpush1.bf16.msra.mxu0 %v1006_v1  ;;  %v1013_v6 = vld [vmem:[%s1471_s1 + $0x4c] ss:$12 sps:$4 sm:$0xff]   ;;  %v1015_v7 = vld [vmem:[%s1471_s1 + $0x48] ss:$12 sps:$4 sm:$0xff]   ;;  %v1016_v10 = vld [vmem:[%s1471_s1 + $0x64] ss:$12 sps:$4 sm:$0xff]  }
   0x4   :  { %678 = vmatprep.subr.bf16.mxu0 %v1007_v2  ;;  %v1025_v8 = vld [vmem:[%s1471_s1 + $0xc8] ss:$12 sps:$4 sm:$0xff]   ;;  %v1030_v11 = vld [vmem:[%s1471_s1 + $0xe0] ss:$12 sps:$4 sm:$0xff]   ;;  %v1035_v15 = vld [vmem:[%s1471_s1 + $0xf8] ss:$12 sps:$4 sm:$0xff]  }
   0x5   :  { %v1026_v9 = vld [vmem:[%s1471_s1 + $0x8] ss:$12 sps:$4 sm:$0xff]   ;;  %956 = vmatprep.subr.bf16.mxu1 %v1025_v8  ;;  %v1031_v12 = vld [vmem:[%s1471_s1 + $0x20] ss:$12 sps:$4 sm:$0xff]   ;;  %v1036_v16 = vld [vmem:[%s1471_s1 + $0x38] ss:$12 sps:$4 sm:$0xff]  }
   0x6   :  { %957 = vmatpush3.bf16.msra.mxu1 %v1026_v9  ;;  %v1018_v13 = vld [vmem:[%s1471_s1 + $0x60] ss:$12 sps:$4 sm:$0xff]   ;;  %v1019_v14 = vld [vmem:[%s1471_s1 + $0x7c] ss:$12 sps:$4 sm:$0xff]   ;;  %v1021_v17 = vld [vmem:[%s1471_s1 + $0x78] ss:$12 sps:$4 sm:$0xff]  }
   0x7   :  { %679 = vmatpush1.bf16.msra.mxu0 %v1009_v3  ;;  %958 = vmatprep.subr.bf16.mxu1 %v1030_v11  ;;  %v1022_v18 = vld [vmem:[%s1471_s1 + $0x94] ss:$12 sps:$4 sm:$0xff]   ;;  %v1040_v19 = vld [vmem:[%s1471_s1 + $0x110] ss:$12 sps:$4 sm:$0xff]   ;;  %v1027_v23 = vld [vmem:[%s1471_s1 + $0xac] ss:$12 sps:$4 sm:$0xff]  }
   0x8   :  { %680 = vmatprep.subr.bf16.mxu0 %v1010_v4  ;;  %v1041_v20 = vld [vmem:[%s1471_s1 + $0x50] ss:$12 sps:$4 sm:$0xff]   ;;  %v1045_v22 = vld [vmem:[%s1471_s1 + $0x128] ss:$12 sps:$4 sm:$0xff]   ;;  %v1050_v25 = vld [vmem:[%s1471_s1 + $0x140] ss:$12 sps:$4 sm:$0xff]  }
   0x9   :  { %v1024_v21 = vld [vmem:[%s1471_s1 + $0x90] ss:$12 sps:$4 sm:$0xff]   ;;  %v1046_v24 = vld [vmem:[%s1471_s1 + $0x68] ss:$12 sps:$4 sm:$0xff]   ;;  %v1051_v28 = vld [vmem:[%s1471_s1 + $0x80] ss:$12 sps:$4 sm:$0xff]  }
   0xa   :  { %959 = vmatpush3.bf16.msra.mxu1 %v1031_v12  ;;  %v1029_v26 = vld [vmem:[%s1471_s1 + $0xa8] ss:$12 sps:$4 sm:$0xff]   ;;  %v1032_v27 = vld [vmem:[%s1471_s1 + $0xc4] ss:$12 sps:$4 sm:$0xff]   ;;  %v1034_v30 = vld [vmem:[%s1471_s1 + $0xc0] ss:$12 sps:$4 sm:$0xff]  }
   0xb   :  { %681 = vmatpush1.bf16.msra.mxu0 %v1012_v5  ;;  %960 = vmatprep.subr.bf16.mxu1 %v1035_v15  ;;  %v1055_v29 = vld [vmem:[%s1471_s1 + $0x158] ss:$12 sps:$4 sm:$0xff]   ;;  %v1037_v31 = vld [vmem:[%s1471_s1 + $0xdc] ss:$12 sps:$4 sm:$0xff]   ;;  %v1042_v35 = vld [vmem:[%s1471_s1 + $0xf4] ss:$12 sps:$4 sm:$0xff]  }
   0xc   :  { %682 = vmatprep.subr.bf16.mxu0 %v1013_v6  ;;  %v1056_v32 = vld [vmem:[%s1471_s1 + $0x98] ss:$12 sps:$4 sm:$0xff]   ;;  %v1060_v33 = vld [vmem:[%s1471_s1 + $0x170] ss:$12 sps:$4 sm:$0xff]   ;;  %v1068_v39 = vld [vmem:[%s1471_s1 + $0x248] ss:$12 sps:$4 sm:$0xff]  }
   0xd   :  { %v1039_v34 = vld [vmem:[%s1471_s1 + $0xd8] ss:$12 sps:$4 sm:$0xff]   ;;  %v1061_v36 = vld [vmem:[%s1471_s1 + $0xb0] ss:$12 sps:$4 sm:$0xff]   ;;  %v1069_v42 = vld [vmem:[%s1471_s1 + $0x188] ss:$12 sps:$4 sm:$0xff]  }
   0xe   :  { %961 = vmatpush3.bf16.msra.mxu1 %v1036_v16  ;;  %v1044_v37 = vld [vmem:[%s1471_s1 + $0xf0] ss:$12 sps:$4 sm:$0xff]   ;;  %v1067_v38 = vld [vmem:[%s1472_s0 + $0x4] ss:$16 sps:$4 sm:$0x3f]  }
   0xf   :  { %683 = vmatpush1.bf16.msra.mxu0 %v1015_v7  ;;  %962 = vmatprep.subr.bf16.mxu1 %v1040_v19  ;;  %v1047_v40 = vld [vmem:[%s1471_s1 + $0x10c] ss:$12 sps:$4 sm:$0xff]   ;;  %v1065_v41 = vld [vmem:[%s1472_s0] ss:$16 sps:$4 sm:$0x3f]  }
  0x10   :  { %684 = vmatprep.subr.bf16.mxu0 %v1016_v10  ;;  %794 = vmatprep.mubr.bf16.mxu1 %v1067_v38  ;;  %v1073_v43 = vld [vmem:[%s1471_s1 + $0x260] ss:$12 sps:$4 sm:$0xff]   ;;  %v1049_v44 = vld [vmem:[%s1471_s1 + $0x108] ss:$12 sps:$4 sm:$0xff]   ;;  %v1052_v45 = vld [vmem:[%s1471_s1 + $0x124] ss:$12 sps:$4 sm:$0xff]  }
  0x11   :  { %708 = vmatprep.mubr.bf16.mxu0 %v1067_v38  ;;  %v1074_v46 = vld [vmem:[%s1471_s1 + $0x1a0] ss:$12 sps:$4 sm:$0xff]   ;;  %v1078_v47 = vld [vmem:[%s1471_s1 + $0x278] ss:$12 sps:$4 sm:$0xff]   ;;  %v1057_v49 = vld [vmem:[%s1471_s1 + $0x13c] ss:$12 sps:$4 sm:$0xff]  }
  0x12   :  { %963 = vmatpush3.bf16.msra.mxu1 %v1041_v20  ;;  %v1054_v48 = vld [vmem:[%s1471_s1 + $0x120] ss:$12 sps:$4 sm:$0xff]   ;;  %v1079_v50 = vld [vmem:[%s1471_s1 + $0x1b8] ss:$12 sps:$4 sm:$0xff]   ;;  %v1083_v51 = vld [vmem:[%s1471_s1 + $0x290] ss:$12 sps:$4 sm:$0xff]  }
  0x13   :  { %685 = vmatpush1.bf16.msra.mxu0 %v1018_v13  ;;  %964 = vmatprep.subr.bf16.mxu1 %v1045_v22  ;;  %v1059_v52 = vld [vmem:[%s1471_s1 + $0x138] ss:$12 sps:$4 sm:$0xff]   ;;  %v1062_v53 = vld [vmem:[%s1471_s1 + $0x154] ss:$12 sps:$4 sm:$0xff]   ;;  %v1084_v54 = vld [vmem:[%s1471_s1 + $0x1d0] ss:$12 sps:$4 sm:$0xff]  }
  0x14   :  { %686 = vmatprep.subr.bf16.mxu0 %v1019_v14  ;;  %v1088_v55 = vld [vmem:[%s1471_s1 + $0x2a8] ss:$12 sps:$4 sm:$0xff]   ;;  %v1064_v56 = vld [vmem:[%s1471_s1 + $0x150] ss:$12 sps:$4 sm:$0xff]   ;;  %v1070_v57 = vld [vmem:[%s1471_s1 + $0x16c] ss:$12 sps:$4 sm:$0xff]  }
  0x15   :  { %v1089_v58 = vld [vmem:[%s1471_s1 + $0x1e8] ss:$12 sps:$4 sm:$0xff]   ;;  %v1093_v59 = vld [vmem:[%s1471_s1 + $0x2c0] ss:$12 sps:$4 sm:$0xff]   ;;  %v1077_v61 = vld [vmem:[%s1471_s1 + $0x184] ss:$12 sps:$4 sm:$0xff]  }
  0x16   :  { %965 = vmatpush3.bf16.msra.mxu1 %v1046_v24  ;;  %v1072_v60 = vld [vmem:[%s1471_s1 + $0x168] ss:$12 sps:$4 sm:$0xff]   ;;  %v1094_v62 = vld [vmem:[%s1471_s1 + $0x200] ss:$12 sps:$4 sm:$0xff]   ;;  %v1098_v63 = vld [vmem:[%s1471_s1 + $0x2d8] ss:$12 sps:$4 sm:$0xff]  }
  0x17   :  { %687 = vmatpush1.bf16.msra.mxu0 %v1021_v17  ;;  %966 = vmatprep.subr.bf16.mxu1 %v1050_v25  ;;  %v1075_v0 = vld [vmem:[%s1471_s1 + $0x180] ss:$12 sps:$4 sm:$0xff]   ;;  %v1082_v1 = vld [vmem:[%s1471_s1 + $0x19c] ss:$12 sps:$4 sm:$0xff]   ;;  %v1099_v2 = vld [vmem:[%s1471_s1 + $0x218] ss:$12 sps:$4 sm:$0xff]  }
  0x18   :  { %688 = vmatprep.subr.bf16.mxu0 %v1022_v18  ;;  %v1110_v3 = vld [vmem:[%s1472_s0 + $0xc] ss:$16 sps:$4 sm:$0x3f]   ;;  %v1080_v5 = vld [vmem:[%s1471_s1 + $0x198] ss:$12 sps:$4 sm:$0xff]  }
  0x19   :  { %v1103_v4 = vld [vmem:[%s1471_s1 + $0x2f0] ss:$12 sps:$4 sm:$0xff]   ;;  %v1087_v6 = vld [vmem:[%s1471_s1 + $0x1b4] ss:$12 sps:$4 sm:$0xff]   ;;  %v1092_v9 = vld [vmem:[%s1471_s1 + $0x1cc] ss:$12 sps:$4 sm:$0xff]  }
  0x1a   :  { %967 = vmatpush3.bf16.msra.mxu1 %v1051_v28  ;;  %v1104_v7 = vld [vmem:[%s1471_s1 + $0x230] ss:$12 sps:$4 sm:$0xff]   ;;  %v1108_v10 = vld [vmem:[%s1472_s0 + $0x8] ss:$16 sps:$4 sm:$0x3f]  }
  0x1b   :  { %689 = vmatpush1.bf16.msra.mxu0 %v1024_v21  ;;  %968 = vmatprep.subr.bf16.mxu1 %v1055_v29  ;;  %v1085_v8 = vld [vmem:[%s1471_s1 + $0x1b0] ss:$12 sps:$4 sm:$0xff]   ;;  %v1090_v11 = vld [vmem:[%s1471_s1 + $0x1c8] ss:$12 sps:$4 sm:$0xff]   ;;  %v1095_v13 = vld [vmem:[%s1471_s1 + $0x1e0] ss:$12 sps:$4 sm:$0xff]  }
  0x1c   :  { %690 = vmatprep.subr.bf16.mxu0 %v1027_v23  ;;  %v1097_v12 = vld [vmem:[%s1471_s1 + $0x1e4] ss:$12 sps:$4 sm:$0xff]   ;;  %v1102_v14 = vld [vmem:[%s1471_s1 + $0x1fc] ss:$12 sps:$4 sm:$0xff]   ;;  %v1107_v16 = vld [vmem:[%s1471_s1 + $0x214] ss:$12 sps:$4 sm:$0xff]  }
  0x1d   :  { %v1100_v15 = vld [vmem:[%s1471_s1 + $0x1f8] ss:$12 sps:$4 sm:$0xff]   ;;  %v1105_v17 = vld [vmem:[%s1471_s1 + $0x210] ss:$12 sps:$4 sm:$0xff]   ;;  %v1111_v19 = vld [vmem:[%s1471_s1 + $0x228] ss:$12 sps:$4 sm:$0xff]  }
  0x1e   :  { %969 = vmatpush3.bf16.msra.mxu1 %v1056_v32  ;;  %v1113_v18 = vld [vmem:[%s1471_s1 + $0x22c] ss:$12 sps:$4 sm:$0xff]   ;;  %v1116_v20 = vld [vmem:[%s1471_s1 + $0x244] ss:$12 sps:$4 sm:$0xff]   ;;  %v1119_v22 = vld [vmem:[%s1471_s1 + $0x25c] ss:$12 sps:$4 sm:$0xff]  }
  0x1f   :  { %691 = vmatpush1.bf16.msra.mxu0 %v1029_v26  ;;  %970 = vmatprep.subr.bf16.mxu1 %v1060_v33  ;;  %v1114_v21 = vld [vmem:[%s1471_s1 + $0x240] ss:$12 sps:$4 sm:$0xff]   ;;  %v1117_v23 = vld [vmem:[%s1471_s1 + $0x258] ss:$12 sps:$4 sm:$0xff]   ;;  %v1120_v25 = vld [vmem:[%s1471_s1 + $0x270] ss:$12 sps:$4 sm:$0xff]  }
  0x20   :  { %692 = vmatprep.subr.bf16.mxu0 %v1032_v27  ;;  %v1122_v24 = vld [vmem:[%s1471_s1 + $0x274] ss:$12 sps:$4 sm:$0xff]   ;;  %v1125_v26 = vld [vmem:[%s1471_s1 + $0x28c] ss:$12 sps:$4 sm:$0xff]   ;;  %v1128_v28 = vld [vmem:[%s1471_s1 + $0x2a4] ss:$12 sps:$4 sm:$0xff]  }
  0x21   :  { %v1123_v27 = vld [vmem:[%s1471_s1 + $0x288] ss:$12 sps:$4 sm:$0xff]   ;;  %v1126_v29 = vld [vmem:[%s1471_s1 + $0x2a0] ss:$12 sps:$4 sm:$0xff]   ;;  %v1132_v33 = vld [vmem:[%s1471_s1 + $0x2d0] ss:$12 sps:$4 sm:$0xff]  }
  0x22   :  { %971 = vmatpush3.bf16.msra.mxu1 %v1061_v36  ;;  %v1134_v32 = vld [vmem:[%s1471_s1 + $0x2d4] ss:$12 sps:$4 sm:$0xff]  }
  0x23   :  { %693 = vmatpush1.bf16.msra.mxu0 %v1034_v30  ;;  %978 = vmatprep.subr.bf16.mxu1 %v1068_v39  ;;  %v1131_v30 = vld [vmem:[%s1471_s1 + $0x2bc] ss:$12 sps:$4 sm:$0xff]  }
  0x24   :  { %694 = vmatprep.subr.bf16.mxu0 %v1037_v31  ;;  %v1129_v31 = vld [vmem:[%s1471_s1 + $0x2b8] ss:$12 sps:$4 sm:$0xff]  }
  0x25   :  { %795 = vmatmul.mubr.bf16.vlgmr.msra.gmra.mrb[0].mxu1 %v1065_v41 }
  0x26   :  { %979 = vmatpush3.bf16.msra.mxu1 %v1069_v42  ;;  %835 = vmatprep.mubr.bf16.mxu1 %v1110_v3 }
  0x27   :  { %695 = vmatpush1.bf16.msra.mxu0 %v1039_v34  ;;  %980 = vmatprep.subr.bf16.mxu1 %v1073_v43  ;;  %v1137_v34 = vld [vmem:[%s1471_s1 + $0x2ec] ss:$12 sps:$4 sm:$0xff]  }
  0x28   :  { %696 = vmatprep.subr.bf16.mxu0 %v1042_v35  ;;  %v1135_v35 = vld [vmem:[%s1471_s1 + $0x2e8] ss:$12 sps:$4 sm:$0xff]  }
  0x2a   :  { %981 = vmatpush3.bf16.msra.mxu1 %v1074_v46 }
  0x2b   :  { %697 = vmatpush1.bf16.msra.mxu0 %v1044_v37  ;;  %982 = vmatprep.subr.bf16.mxu1 %v1078_v47 }
  0x2c   :  { %698 = vmatprep.subr.bf16.mxu0 %v1047_v40 }
  0x2e   :  { %983 = vmatpush3.bf16.msra.mxu1 %v1079_v50 }
  0x2f   :  { %699 = vmatpush1.bf16.msra.mxu0 %v1049_v44  ;;  %984 = vmatprep.subr.bf16.mxu1 %v1083_v51 }
  0x30   :  { %700 = vmatprep.subr.bf16.mxu0 %v1052_v45 }
  0x32   :  { %985 = vmatpush3.bf16.msra.mxu1 %v1084_v54 }
  0x33   :  { %701 = vmatpush1.bf16.msra.mxu0 %v1054_v48  ;;  %986 = vmatprep.subr.bf16.mxu1 %v1088_v55 }
  0x34   :  { %702 = vmatprep.subr.bf16.mxu0 %v1057_v49 }
  0x36   :  { %987 = vmatpush3.bf16.msra.mxu1 %v1089_v58 }
  0x37   :  { %703 = vmatpush1.bf16.msra.mxu0 %v1059_v52  ;;  %988 = vmatprep.subr.bf16.mxu1 %v1093_v59 }
  0x38   :  { %704 = vmatprep.subr.bf16.mxu0 %v1062_v53 }
  0x3a   :  { %989 = vmatpush3.bf16.msra.mxu1 %v1094_v62 }
  0x3b   :  { %705 = vmatpush1.bf16.msra.mxu0 %v1064_v56  ;;  %990 = vmatprep.subr.bf16.mxu1 %v1098_v63 }
  0x3c   :  { %706 = vmatprep.subr.bf16.mxu0 %v1070_v57 }
  0x3e   :  { %991 = vmatpush3.bf16.msra.mxu1 %v1099_v2 }
  0x3f   :  { %707 = vmatpush1.bf16.msra.mxu0 %v1072_v60  ;;  %992 = vmatprep.subr.bf16.mxu1 %v1103_v4 }
  0x40   :  { %719 = vmatprep.subr.bf16.mxu0 %v1077_v61 }
  0x42   :  { %709 = vmatmul.mubr.bf16.vlgmr.msra.gmra.mrb[0].mxu0 %v1065_v41  ;;  %993 = vmatpush3.bf16.msra.mxu1 %v1104_v7 }
  0x43   :  { %720 = vmatpush1.bf16.msra.mxu0 %v1075_v0  ;;  %751 = vmatprep.mubr.bf16.mxu0 %v1110_v3 }
  0x44   :  { %721 = vmatprep.subr.bf16.mxu0 %v1082_v1 }
  0x45   :  { %836 = vmatmul.mubr.bf16.vlgmr.msra.gmra.mrb[4].mxu1 %v1108_v10 }
  0x47   :  { %722 = vmatpush1.bf16.msra.mxu0 %v1080_v5 }
  0x48   :  { %723 = vmatprep.subr.bf16.mxu0 %v1087_v6 }
  0x4b   :  { %724 = vmatpush1.bf16.msra.mxu0 %v1085_v8 }
  0x4c   :  { %725 = vmatprep.subr.bf16.mxu0 %v1092_v9 }
  0x4f   :  { %726 = vmatpush1.bf16.msra.mxu0 %v1090_v11 }
  0x50   :  { %727 = vmatprep.subr.bf16.mxu0 %v1097_v12 }
  0x53   :  { %728 = vmatpush1.bf16.msra.mxu0 %v1095_v13 }
  0x54   :  { %729 = vmatprep.subr.bf16.mxu0 %v1102_v14 }
  0x57   :  { %730 = vmatpush1.bf16.msra.mxu0 %v1100_v15 }
  0x58   :  { %731 = vmatprep.subr.bf16.mxu0 %v1107_v16 }
  0x5b   :  { %732 = vmatpush1.bf16.msra.mxu0 %v1105_v17 }
  0x5c   :  { %733 = vmatprep.subr.bf16.mxu0 %v1113_v18 }
  0x5f   :  { %734 = vmatpush1.bf16.msra.mxu0 %v1111_v19 }
  0x60   :  { %735 = vmatprep.subr.bf16.mxu0 %v1116_v20 }
  0x63   :  { %736 = vmatpush1.bf16.msra.mxu0 %v1114_v21 }
  0x64   :  { %737 = vmatprep.subr.bf16.mxu0 %v1119_v22 }
  0x67   :  { %738 = vmatpush1.bf16.msra.mxu0 %v1117_v23 }
  0x68   :  { %739 = vmatprep.subr.bf16.mxu0 %v1122_v24 }
  0x6b   :  { %740 = vmatpush1.bf16.msra.mxu0 %v1120_v25 }
  0x6c   :  { %741 = vmatprep.subr.bf16.mxu0 %v1125_v26 }
  0x6f   :  { %742 = vmatpush1.bf16.msra.mxu0 %v1123_v27 }
  0x70   :  { %743 = vmatprep.subr.bf16.mxu0 %v1128_v28 }
  0x73   :  { %744 = vmatpush1.bf16.msra.mxu0 %v1126_v29 }
  0x74   :  { %745 = vmatprep.subr.bf16.mxu0 %v1131_v30 }
  0x77   :  { %746 = vmatpush1.bf16.msra.mxu0 %v1129_v31 }
  0x78   :  { %747 = vmatprep.subr.bf16.mxu0 %v1134_v32 }
  0x7b   :  { %748 = vmatpush1.bf16.msra.mxu0 %v1132_v33 }
  0x7c   :  { %749 = vmatprep.subr.bf16.mxu0 %v1137_v34 }
  0x7f   :  { %750 = vmatpush1.bf16.msra.mxu0 %v1135_v35 }
  0x82   :  { %752 = vmatmul.mubr.bf16.vlgmr.msra.gmra.mrb[0].mxu0 %v1108_v10 }
  0xf8   :  { %v972_v36 = vpop.f32.mrb[0].mxu1 }
  0xf9   :  { %v973_v37 = vpop.f32.mrb[1].mxu1 }
  0xfa   :  { %v974_v38 = vadd.f32 %v973_v37, %v972_v36  ;;  %v975_v39 = vpop.f32.mrb[2].mxu1 }
  0xfb   :  { %v976_v40 = vpop.f32.mrb[3].mxu1 }
  0xfc   :  { %v977_v41 = vadd.f32 %v976_v40, %v975_v39 }
 0x118   :  { %v994_v42 = vpop.f32.mrb[4].mxu1 }
 0x119   :  { %v995_v43 = vpop.f32.mrb[5].mxu1 }
 0x11a   :  { %v996_v44 = vadd.f32 %v995_v43, %v994_v42  ;;  %v997_v45 = vpop.f32.mrb[6].mxu1 }
 0x11b   :  { %v998_v46 = vpop.f32.mrb[7].mxu1 }
 0x11c   :  { %v838_v47 = vadd.f32 %v996_v44, %v974_v38  ;;  %v999_v48 = vadd.f32 %v998_v46, %v997_v45 }
 0x11e   :  { %847 = vst.msk [vmem:[%s1473_s2 + $0x10] sm:$0xff] %vm846_vm0, %v838_v47  ;;  %v841_v49 = vadd.f32 %v999_v48, %v977_v41 }
 0x120   :  { %851 = vst.msk [vmem:[%s1473_s2 + $0x28] sm:$0xf] %vm850_vm1, %v841_v49 }
 0x155   :  { %v753_v50 = vpop.f32.mrb[0].mxu0 }
 0x156   :  { %844 = vst [vmem:[%s1473_s2] sm:$0xff] %v753_v50  ;;  %v755_v51 = vpop.f32.mrb[1].mxu0 }
 0x157   :  { %845 = vst [vmem:[%s1473_s2 + $0x8] sm:$0xff] %v755_v51  ;;  %v757_v52 = vpop.f32.mrb[2].mxu0 }
 0x158   :  { %848 = vst [vmem:[%s1473_s2 + $0x18] sm:$0xf] %v757_v52  ;;  %v759_v53 = vpop.f32.mrb[3].mxu0 }
 0x159   :  { %849 = vst [vmem:[%s1473_s2 + $0x20] sm:$0xf] %v759_v53 }

// kernel: dnn_forward.6
= control target key start
LH: loop header
LB: loop body
LE: loop exit
PB: predicated region body
PF: predicated region fallthrough
CT: control target
= control target key end

     0   :  { %vm188_vm0 = vcmask 585728   ;;  %s321_s1 = inlined_call_operand.vmem [shape: bf16[256,72], index: 1, kind: input, shape index: {}]   ;;  %s322_s0 = inlined_call_operand.vmem [shape: bf16[5,256], index: 0, kind: input, shape index: {}]   ;;  %s323_s2 = inlined_call_operand.vmem [shape: f32[5,72], index: 2, kind: output, shape index: {}]  }
   0x1   :  { %v234_v0 = vld [vmem:[%s321_s1 + $0x40] sm:$0xff]   ;;  %v236_v2 = vld [vmem:[%s321_s1 + $0x48] sm:$0xff]   ;;  %v238_v4 = vld [vmem:[%s321_s1 + $0x50] sm:$0xff]  }
   0x2   :  { %v235_v1 = vld [vmem:[%s321_s1] sm:$0xff]   ;;  %212 = vmatprep.subr.bf16.mxu0 %v234_v0  ;;  %v237_v3 = vld [vmem:[%s321_s1 + $0x8] sm:$0xff]   ;;  %v239_v5 = vld [vmem:[%s321_s1 + $0x10] sm:$0xff]  }
   0x3   :  { %213 = vmatpush3.bf16.msra.mxu0 %v235_v1  ;;  %v240_v6 = vld [vmem:[%s321_s1 + $0x58] sm:$0xff]   ;;  %v242_v8 = vld [vmem:[%s321_s1 + $0x60] sm:$0xff]   ;;  %v244_v10 = vld [vmem:[%s321_s1 + $0x68] sm:$0xff]  }
   0x4   :  { %214 = vmatprep.subr.bf16.mxu0 %v236_v2  ;;  %v241_v7 = vld [vmem:[%s321_s1 + $0x18] sm:$0xff]   ;;  %v243_v9 = vld [vmem:[%s321_s1 + $0x20] sm:$0xff]   ;;  %v245_v13 = vld [vmem:[%s321_s1 + $0x28] sm:$0xff]  }
   0x5   :  { %v12_v11 = vld [vmem:[%s322_s0] sm:$0x77]  ;;  %v246_v14 = vld [vmem:[%s321_s1 + $0x70] sm:$0xff]   ;;  %v248_v16 = vld [vmem:[%s321_s1 + $0x78] sm:$0xff]  }
   0x6   :  { %v195_v12 = vcombine.high %v12_v11, %v12_v11  ;;  %v247_v15 = vld [vmem:[%s321_s1 + $0x30] sm:$0xff]   ;;  %v249_v17 = vld [vmem:[%s321_s1 + $0x38] sm:$0xff]   ;;  %v194_v18 = vcombine.low %v12_v11, %v12_v11 }
   0x7   :  { %215 = vmatpush3.bf16.msra.mxu0 %v237_v3 }
   0x8   :  { %216 = vmatprep.subr.bf16.mxu0 %v238_v4  ;;  %180 = vmatprep.mubr.bf16.mxu0 %v195_v12 }
   0xb   :  { %217 = vmatpush3.bf16.msra.mxu0 %v239_v5 }
   0xc   :  { %218 = vmatprep.subr.bf16.mxu0 %v240_v6 }
   0xf   :  { %219 = vmatpush3.bf16.msra.mxu0 %v241_v7 }
  0x10   :  { %220 = vmatprep.subr.bf16.mxu0 %v242_v8 }
  0x13   :  { %221 = vmatpush3.bf16.msra.mxu0 %v243_v9 }
  0x14   :  { %222 = vmatprep.subr.bf16.mxu0 %v244_v10 }
  0x17   :  { %223 = vmatpush3.bf16.msra.mxu0 %v245_v13 }
  0x18   :  { %224 = vmatprep.subr.bf16.mxu0 %v246_v14 }
  0x1b   :  { %225 = vmatpush3.bf16.msra.mxu0 %v247_v15 }
  0x1c   :  { %226 = vmatprep.subr.bf16.mxu0 %v248_v16 }
  0x1f   :  { %227 = vmatpush3.bf16.msra.mxu0 %v249_v17 }
  0x22   :  { %181 = vmatmul.mubr.bf16.vlgmr.msra.gmra.mrb[0].mxu0 %v194_v18 }
  0xf5   :  { %v228_v19 = vpop.f32.mrb[0].mxu0 }
  0xf6   :  { %v229_v20 = vpop.f32.mrb[1].mxu0 }
  0xf7   :  { %v230_v21 = vadd.f32 %v229_v20, %v228_v19  ;;  %v231_v22 = vpop.f32.mrb[2].mxu0 }
  0xf8   :  { %v232_v23 = vpop.f32.mrb[3].mxu0 }
  0xf9   :  { %189 = vst.msk [vmem:[%s323_s2] sm:$0x1f] %vm188_vm0, %v230_v21 }

// kernel: dnn_forward.7
= control target key start
LH: loop header
LB: loop body
LE: loop exit
PB: predicated region body
PF: predicated region fallthrough
CT: control target
= control target key end

     0   :  { %v750_v22 = vmov 1966171168   ;;  %v114_v24 = vlaneseq  ;;  %vm576_vm0 = vcmask 9216   ;;  %s916_s1 = inlined_call_operand.vmem [shape: bf16[768,2], index: 1, kind: input, shape index: {}]   ;;  %s917_s0 = inlined_call_operand.vmem [shape: bf16[2,768], index: 0, kind: input, shape index: {}]   ;;  %s918_s2 = inlined_call_operand.vmem [shape: f32[2,2], index: 2, kind: output, shape index: {}]  }
   0x1   :  { %v697_v0 = vld [vmem:[%s916_s1 + $0x40] sm:$0xff]   ;;  %v701_v4 = vld [vmem:[%s916_s1 + $0x48] sm:$0xff]   ;;  %v705_v8 = vld [vmem:[%s916_s1 + $0x50] sm:$0xff]   ;;  %v112_v23 = vunpack.c.l.s4 %v750_v22 }
   0x2   :  { %v698_v1 = vld [vmem:[%s916_s1 + $0xc0] sm:$0xff]   ;;  %630 = vmatprep.subr.bf16.mxu0 %v697_v0  ;;  %v702_v5 = vld [vmem:[%s916_s1 + $0xc8] sm:$0xff]   ;;  %v706_v9 = vld [vmem:[%s916_s1 + $0xd0] sm:$0xff]   ;;  %v115_v30 = vshrl.u32 %v114_v24, 7 }
   0x3   :  { %v699_v2 = vld [vmem:[%s916_s1] sm:$0xff]   ;;  %652 = vmatprep.subr.bf16.mxu1 %v698_v1  ;;  %v703_v6 = vld [vmem:[%s916_s1 + $0x8] sm:$0xff]   ;;  %v707_v10 = vld [vmem:[%s916_s1 + $0x10] sm:$0xff]   ;;  %v113_v29 = vunpack.c.0.s8 %v112_v23 }
   0x4   :  { %v700_v3 = vld [vmem:[%s916_s1 + $0x80] sm:$0xff]   ;;  %631 = vmatpush3.bf16.msra.mxu0 %v699_v2  ;;  %v704_v7 = vld [vmem:[%s916_s1 + $0x88] sm:$0xff]   ;;  %v708_v11 = vld [vmem:[%s916_s1 + $0x90] sm:$0xff]  }
   0x5   :  { %653 = vmatpush3.bf16.msra.mxu1 %v700_v3  ;;  %632 = vmatprep.subr.bf16.mxu0 %v701_v4  ;;  %v709_v12 = vld [vmem:[%s916_s1 + $0x58] sm:$0xff]   ;;  %v713_v16 = vld [vmem:[%s916_s1 + $0x60] sm:$0xff]   ;;  %v717_v20 = vld [vmem:[%s916_s1 + $0x68] sm:$0xff]   ;;  %v116_v35 = vsub.s32 %v113_v29, %v115_v30 }
   0x6   :  { %654 = vmatprep.subr.bf16.mxu1 %v702_v5  ;;  %v710_v13 = vld [vmem:[%s916_s1 + $0xd8] sm:$0xff]   ;;  %v714_v17 = vld [vmem:[%s916_s1 + $0xe0] sm:$0xff]   ;;  %v718_v21 = vld [vmem:[%s916_s1 + $0xe8] sm:$0xff]  }
   0x7   :  { %v711_v14 = vld [vmem:[%s916_s1 + $0x18] sm:$0xff]   ;;  %v715_v18 = vld [vmem:[%s916_s1 + $0x20] sm:$0xff]   ;;  %v719_v25 = vld [vmem:[%s916_s1 + $0x28] sm:$0xff]  }
   0x8   :  { %633 = vmatpush3.bf16.msra.mxu0 %v703_v6  ;;  %v712_v15 = vld [vmem:[%s916_s1 + $0x98] sm:$0xff]   ;;  %v716_v19 = vld [vmem:[%s916_s1 + $0xa0] sm:$0xff]   ;;  %v720_v26 = vld [vmem:[%s916_s1 + $0xa8] sm:$0xff]  }
   0x9   :  { %655 = vmatpush3.bf16.msra.mxu1 %v704_v7  ;;  %634 = vmatprep.subr.bf16.mxu0 %v705_v8  ;;  %v721_v27 = vld [vmem:[%s916_s1 + $0x70] sm:$0xff]   ;;  %v725_v33 = vld [vmem:[%s916_s1 + $0x78] sm:$0xff]   ;;  %v12_v38 = vld [vmem:[%s917_s0] sm:$0x3f] }
   0xa   :  { %656 = vmatprep.subr.bf16.mxu1 %v706_v9  ;;  %v722_v28 = vld [vmem:[%s916_s1 + $0xf0] sm:$0xff]   ;;  %v726_v34 = vld [vmem:[%s916_s1 + $0xf8] sm:$0xff]   ;;  %v110_v39 = vcombine.high %v12_v38, %v12_v38  ;;  %v117_v40 = vrot.slane %v12_v38, %v116_v35  ;;  %v730_v41 = vld [vmem:[%s916_s1 + $0x140] sm:$0xff]  }
   0xb   :  { %v723_v31 = vld [vmem:[%s916_s1 + $0x30] sm:$0xff]   ;;  %v727_v36 = vld [vmem:[%s916_s1 + $0x38] sm:$0xff]   ;;  %v731_v46 = vld [vmem:[%s916_s1 + $0x100] sm:$0xff]  }
   0xc   :  { %635 = vmatpush3.bf16.msra.mxu0 %v707_v10  ;;  %v724_v32 = vld [vmem:[%s916_s1 + $0xb0] sm:$0xff]   ;;  %v728_v37 = vld [vmem:[%s916_s1 + $0xb8] sm:$0xff]   ;;  %v125_v42 = vcombine.high %v117_v40, %v117_v40  ;;  %v133_v43 = vrot.slane %v117_v40, %v116_v35  ;;  %v124_v44 = vrot.slane %v110_v39, %v116_v35  ;;  %v732_v49 = vld [vmem:[%s916_s1 + $0x148] sm:$0xff]  }
   0xd   :  { %657 = vmatpush3.bf16.msra.mxu1 %v708_v11  ;;  %636 = vmatprep.subr.bf16.mxu0 %v709_v12  ;;  %v733_v52 = vld [vmem:[%s916_s1 + $0x108] sm:$0xff]   ;;  %v734_v53 = vld [vmem:[%s916_s1 + $0x150] sm:$0xff]   ;;  %v736_v55 = vld [vmem:[%s916_s1 + $0x158] sm:$0xff]  }
   0xe   :  { %658 = vmatprep.subr.bf16.mxu1 %v710_v13  ;;  %v147_v45 = vrot.slane %v125_v42, %v116_v35  ;;  %v126_v47 = vcombine.high %v124_v44, %v124_v44  ;;  %v155_v48 = vcombine.high %v133_v43, %v133_v43  ;;  %v735_v54 = vld [vmem:[%s916_s1 + $0x110] sm:$0xff]   ;;  %v737_v56 = vld [vmem:[%s916_s1 + $0x118] sm:$0xff]   ;;  %v738_v57 = vld [vmem:[%s916_s1 + $0x160] sm:$0xff]   ;;  %v140_v1 = vrot.slane %v124_v44, %v116_v35 }
   0xf   :  { %v739_v58 = vld [vmem:[%s916_s1 + $0x120] sm:$0xff]   ;;  %v740_v59 = vld [vmem:[%s916_s1 + $0x168] sm:$0xff]   ;;  %v742_v61 = vld [vmem:[%s916_s1 + $0x170] sm:$0xff]  }
  0x10   :  { %637 = vmatpush3.bf16.msra.mxu0 %v711_v14  ;;  %483 = vmatprep.mubr.bf16.mxu0 %v147_v45  ;;  %v156_v50 = vcombine.high %v147_v45, %v147_v45  ;;  %v154_v51 = vrot.slane %v126_v47, %v116_v35  ;;  %v741_v60 = vld [vmem:[%s916_s1 + $0x128] sm:$0xff]   ;;  %v743_v62 = vld [vmem:[%s916_s1 + $0x130] sm:$0xff]   ;;  %v744_v63 = vld [vmem:[%s916_s1 + $0x178] sm:$0xff]  }
  0x11   :  { %659 = vmatpush3.bf16.msra.mxu1 %v712_v15  ;;  %638 = vmatprep.subr.bf16.mxu0 %v713_v16  ;;  %v745_v0 = vld [vmem:[%s916_s1 + $0x138] sm:$0xff]  }
  0x12   :  { %660 = vmatprep.subr.bf16.mxu1 %v714_v17  ;;  %523 = vmatprep.mubr.bf16.mxu1 %v156_v50 }
  0x14   :  { %639 = vmatpush3.bf16.msra.mxu0 %v715_v18 }
  0x15   :  { %661 = vmatpush3.bf16.msra.mxu1 %v716_v19  ;;  %640 = vmatprep.subr.bf16.mxu0 %v717_v20 }
  0x16   :  { %662 = vmatprep.subr.bf16.mxu1 %v718_v21 }
  0x18   :  { %641 = vmatpush3.bf16.msra.mxu0 %v719_v25 }
  0x19   :  { %663 = vmatpush3.bf16.msra.mxu1 %v720_v26  ;;  %642 = vmatprep.subr.bf16.mxu0 %v721_v27 }
  0x1a   :  { %664 = vmatprep.subr.bf16.mxu1 %v722_v28 }
  0x1c   :  { %643 = vmatpush3.bf16.msra.mxu0 %v723_v31 }
  0x1d   :  { %665 = vmatpush3.bf16.msra.mxu1 %v724_v32  ;;  %644 = vmatprep.subr.bf16.mxu0 %v725_v33 }
  0x1e   :  { %666 = vmatprep.subr.bf16.mxu1 %v726_v34 }
  0x20   :  { %645 = vmatpush3.bf16.msra.mxu0 %v727_v36 }
  0x21   :  { %667 = vmatpush3.bf16.msra.mxu1 %v728_v37  ;;  %674 = vmatprep.subr.bf16.mxu0 %v730_v41 }
  0x23   :  { %484 = vmatmul.mubr.bf16.vlgmr.msra.gmra.mrb[0].mxu0 %v133_v43 }
  0x24   :  { %675 = vmatpush3.bf16.msra.mxu0 %v731_v46  ;;  %524 = vmatmul.mubr.bf16.vlgmr.msra.gmra.mrb[0].mxu1 %v155_v48 }
  0x25   :  { %676 = vmatprep.subr.bf16.mxu0 %v732_v49  ;;  %563 = vmatprep.mubr.bf16.mxu0 %v154_v51 }
  0x28   :  { %677 = vmatpush3.bf16.msra.mxu0 %v733_v52 }
  0x29   :  { %678 = vmatprep.subr.bf16.mxu0 %v734_v53 }
  0x2c   :  { %679 = vmatpush3.bf16.msra.mxu0 %v735_v54 }
  0x2d   :  { %680 = vmatprep.subr.bf16.mxu0 %v736_v55 }
  0x30   :  { %681 = vmatpush3.bf16.msra.mxu0 %v737_v56 }
  0x31   :  { %682 = vmatprep.subr.bf16.mxu0 %v738_v57 }
  0x34   :  { %683 = vmatpush3.bf16.msra.mxu0 %v739_v58 }
  0x35   :  { %684 = vmatprep.subr.bf16.mxu0 %v740_v59 }
  0x38   :  { %685 = vmatpush3.bf16.msra.mxu0 %v741_v60 }
  0x39   :  { %686 = vmatprep.subr.bf16.mxu0 %v742_v61 }
  0x3c   :  { %687 = vmatpush3.bf16.msra.mxu0 %v743_v62 }
  0x3d   :  { %688 = vmatprep.subr.bf16.mxu0 %v744_v63 }
  0x40   :  { %689 = vmatpush3.bf16.msra.mxu0 %v745_v0 }
  0x43   :  { %564 = vmatmul.mubr.bf16.vlgmr.msra.gmra.mrb[4].mxu0 %v140_v1 }
  0xf6   :  { %v646_v2 = vpop.f32.mrb[0].mxu0 }
  0xf7   :  { %v647_v3 = vpop.f32.mrb[1].mxu0  ;;  %v668_v4 = vpop.f32.mrb[0].mxu1 }
  0xf8   :  { %v648_v5 = vadd.f32 %v647_v3, %v646_v2  ;;  %v649_v6 = vpop.f32.mrb[2].mxu0  ;;  %v669_v7 = vpop.f32.mrb[1].mxu1 }
  0xf9   :  { %v650_v8 = vpop.f32.mrb[3].mxu0  ;;  %v670_v9 = vadd.f32 %v669_v7, %v668_v4  ;;  %v671_v10 = vpop.f32.mrb[2].mxu1 }
  0xfa   :  { %v672_v11 = vpop.f32.mrb[3].mxu1 }
  0xfb   :  { %v526_v12 = vadd.f32 %v670_v9, %v648_v5 }
 0x116   :  { %v690_v13 = vpop.f32.mrb[4].mxu0 }
 0x117   :  { %v691_v14 = vpop.f32.mrb[5].mxu0 }
 0x118   :  { %v692_v15 = vadd.f32 %v691_v14, %v690_v13  ;;  %v693_v16 = vpop.f32.mrb[6].mxu0 }
 0x119   :  { %v694_v17 = vpop.f32.mrb[7].mxu0 }
 0x11a   :  { %v566_v18 = vadd.f32 %v692_v15, %v526_v12 }
 0x11c   :  { %v571_v19 = vsub.f32 0.0, %v566_v18 }
 0x11e   :  { %v572_v20 = vmul.f32 1.442695, %v571_v19 }
 0x120   :  { %746 = vpow2.f32 %v572_v20 }
 0x12a   :  { %v747_v21 = vpop.eup %746 }
 0x12b   :  { %v574_v22 = vadd.f32 1.0, %v747_v21 }
 0x12d   :  { %748 = vrcp.f32 %v574_v22 }
 0x137   :  { %v749_v23 = vpop.eup %748 }
 0x138   :  { %577 = vst.msk [vmem:[%s918_s2] sm:$0x3] %vm576_vm0, %v749_v23 }

</bundles_post_ra>
